<compile_context>
chip_gen: v5e
topology: v5e:2x2
jax: 0.10.0
libtpu: 0.0.40
codegen_flags: <defaults>
</compile_context>

<pallas_src>
import jax
import jax.numpy as jnp
from jax.experimental import pallas as pl
from jax.experimental.pallas import tpu as pltpu


def _layernorm(z, gamma, beta, eps=1e-5):
    mu = jnp.mean(z, axis=-1, keepdims=True)
    zc = z - mu
    var = jnp.mean(zc * zc, axis=-1, keepdims=True)
    return zc * jax.lax.rsqrt(var + eps) * gamma + beta


def _make_block_kernel(SB, T, C, NH, HS):
    M = SB * T

    def kernel(x_ref, wqkv_ref, wproj_ref, wfc1_ref, bfc1_ref, wfc2_ref,
               vecs_ref, o_ref):
        mxu_dt = wqkv_ref.dtype
        x = x_ref[...].reshape(M, C)                                 # (M, C) f32

        vecs = vecs_ref[...]                                         # (8, C) f32 packed
        b_proj = vecs[0:1, :]
        g1, beta1 = vecs[1:2, :], vecs[2:3, :]
        b_fc2 = vecs[3:4, :]
        g2, beta2 = vecs[4:5, :], vecs[5:6, :]

        # ---- fused QKV projection: one MXU matmul for all heads (bf16 in, f32 acc) ----
        # (1/sqrt(HS) already folded into the Q columns of wqkv on the host)
        qkv = jnp.dot(x.astype(mxu_dt), wqkv_ref[...],
                      preferred_element_type=jnp.float32)            # (M, 3C) f32

        # single (T, T) additive causal bias, hoisted; finite value avoids exp(-inf--inf)=NaN
        row = jax.lax.broadcasted_iota(jnp.int32, (T, T), 0)
        col = jax.lax.broadcasted_iota(jnp.int32, (T, T), 1)
        bias = jnp.where(row >= col, 0.0, -1e30)[None]               # (1, T, T) f32

        # ---- per-head attention; output projection folded per head (no lane concat) ----
        y = jnp.zeros((M, C), jnp.float32)
        for h in range(NH):                                          # static unroll, NH small
            q = qkv[:, h * HS:(h + 1) * HS].reshape(SB, T, HS).astype(mxu_dt)
            k = qkv[:, C + h * HS:C + (h + 1) * HS].reshape(SB, T, HS).astype(mxu_dt)
            v = qkv[:, 2 * C + h * HS:2 * C + (h + 1) * HS].reshape(SB, T, HS).astype(mxu_dt)

            # contraction on the last axis of both q and k -> no explicit k.T
            s = jnp.einsum('bqd,bkd->bqk', q, k,
                           preferred_element_type=jnp.float32) + bias   # (SB, T, T) f32
            m = jnp.max(s, axis=-1, keepdims=True)
            e = jnp.exp(s - m)
            p = e * pl.reciprocal(jnp.sum(e, axis=-1, keepdims=True),
                                  approx=True)                        # EUP slot

            o_h = jnp.einsum('bqk,bkd->bqd', p.astype(mxu_dt), v,
                             preferred_element_type=jnp.float32)      # (SB, T, HS) f32
            y = y + jnp.dot(o_h.reshape(M, HS).astype(mxu_dt), wproj_ref[h],
                            preferred_element_type=jnp.float32)       # += o_h @ Wproj[h]
        y = y + b_proj

        # residual + LayerNorm 1 (f32)
        h1 = _layernorm(x + y, g1, beta1)

        # FeedForward: Linear -> ReLU -> Linear  (dropout = identity in eval)
        f = jnp.dot(h1.astype(mxu_dt), wfc1_ref[...],
                    preferred_element_type=jnp.float32) + bfc1_ref[...]
        f = jnp.maximum(f, 0.0)
        f = jnp.dot(f.astype(mxu_dt), wfc2_ref[...],
                    preferred_element_type=jnp.float32) + b_fc2

        # residual + LayerNorm 2 (f32)
        out = _layernorm(h1 + f, g2, beta2)
        o_ref[...] = out.reshape(SB, T, C).astype(o_ref.dtype)

    return kernel


def prepare_block_params(params, mxu_dtype=jnp.bfloat16):
    """One-time host-side weight fusion / layout prep (NOT in the per-call path)."""
    C = params['w_proj'].shape[0]
    NH = len(params['wq'])
    HS = C // NH
    HID = params['w_fc1'].shape[1]

    # [ Wq_all * HS^-0.5 | Wk_all | Wv_all ]  ->  (C, 3C), bf16 MXU operand
    wq_all = jnp.concatenate(params['wq'], axis=1) * (HS ** -0.5)
    wk_all = jnp.concatenate(params['wk'], axis=1)
    wv_all = jnp.concatenate(params['wv'], axis=1)
    wqkv = jnp.concatenate([wq_all, wk_all, wv_all], axis=1).astype(mxu_dtype)

    zeros = jnp.zeros((C,), jnp.float32)
    vecs = jnp.stack([params['b_proj'], params['g1'], params['beta1'],
                      params['b_fc2'], params['g2'], params['beta2'],
                      zeros, zeros], axis=0).astype(jnp.float32)      # (8, C)

    return {
        'wqkv': wqkv,
        'wproj': params['w_proj'].reshape(NH, HS, C).astype(mxu_dtype),
        'wfc1': params['w_fc1'].astype(mxu_dtype),
        'bfc1': params['b_fc1'].reshape(1, HID).astype(jnp.float32),
        'wfc2': params['w_fc2'].astype(mxu_dtype),
        'vecs': vecs,
        'NH': NH, 'HS': HS, 'HID': HID,
    }


def block_forward(x, fused, *, seq_per_block=1):
    """x: (B, T, C) float32; fused: output of prepare_block_params. Returns (B, T, C)."""
    B, T, C = x.shape
    NH, HS, HID = fused['NH'], fused['HS'], fused['HID']
    SB = seq_per_block
    assert B % SB == 0

    const2 = lambda i: (0, 0)
    const3 = lambda i: (0, 0, 0)

    return pl.pallas_call(
        _make_block_kernel(SB, T, C, NH, HS),
        out_shape=jax.ShapeDtypeStruct((B, T, C), x.dtype),
        grid=(B // SB,),
        in_specs=[
            pl.BlockSpec((SB, T, C), lambda i: (i, 0, 0)),   # activation tile (pipelined)
            pl.BlockSpec((C, 3 * C), const2),                # resident weights below
            pl.BlockSpec((NH, HS, C), const3),
            pl.BlockSpec((C, HID), const2),
            pl.BlockSpec((1, HID), const2),
            pl.BlockSpec((HID, C), const2),
            pl.BlockSpec((8, C), const2),
        ],
        out_specs=pl.BlockSpec((SB, T, C), lambda i: (i, 0, 0)),
        compiler_params=pltpu.CompilerParams(
            dimension_semantics=("parallel",),               # shard row grid across TCs (v7x)
            vmem_limit_bytes=64 * 1024 * 1024),              # headroom; tune per generation
    )(x, fused['wqkv'], fused['wproj'], fused['wfc1'], fused['bfc1'],
      fused['wfc2'], fused['vecs'])


def reference_block(x, params):
    """Pure-JAX f32 reference mirroring the PyTorch forward (eval mode)."""
    B, T, C = x.shape
    NH = len(params['wq'])
    HS = C // NH
    tril = jnp.tril(jnp.ones((T, T), dtype=bool))
    heads = []
    for h in range(NH):
        q = x @ params['wq'][h]
        k = x @ params['wk'][h]
        v = x @ params['wv'][h]
        wei = (q @ jnp.swapaxes(k, -2, -1)) * (HS ** -0.5)
        wei = jnp.where(tril, wei, -jnp.inf)
        wei = jax.nn.softmax(wei, axis=-1)
        heads.append(wei @ v)
    y = jnp.concatenate(heads, axis=-1) @ params['w_proj'] + params['b_proj']
    h1 = _layernorm(x + y, params['g1'], params['beta1'])
    f = jax.nn.relu(h1 @ params['w_fc1'] + params['b_fc1']) @ params['w_fc2'] + params['b_fc2']
    return _layernorm(h1 + f, params['g2'], params['beta2'])


if __name__ == "__main__":
    # config: n_embd=128, n_head=4 (head_size=32), block_size T=8, batch=2, dropout=0 (eval)
    B, T, C, NH = 2, 8, 128, 4
    HS = C // NH
    HID = 4 * C

    key = jax.random.PRNGKey(0)
    ks = jax.random.split(key, 20)

    def unif(k, shape, fan_in):
        b = 1.0 / (fan_in ** 0.5)
        return jax.random.uniform(k, shape, minval=-b, maxval=b, dtype=jnp.float32)

    x = jax.random.normal(ks[0], (B, T, C), dtype=jnp.float32)

    params = {
        'wq': [unif(ks[1 + h], (C, HS), C) for h in range(NH)],
        'wk': [unif(ks[5 + h], (C, HS), C) for h in range(NH)],
        'wv': [unif(ks[9 + h], (C, HS), C) for h in range(NH)],
        'w_proj': unif(ks[13], (C, C), C),
        'b_proj': unif(ks[14], (C,), C),
        'w_fc1': unif(ks[15], (C, HID), C),
        'b_fc1': unif(ks[16], (HID,), C),
        'w_fc2': unif(ks[17], (HID, C), HID),
        'b_fc2': unif(ks[18], (C,), HID),
        'g1': 1.0 + 0.1 * jax.random.normal(ks[19], (C,), dtype=jnp.float32),
        'beta1': jnp.full((C,), 0.05, jnp.float32),
        'g2': jnp.full((C,), 0.9, jnp.float32),
        'beta2': jnp.full((C,), -0.05, jnp.float32),
    }

    fused = prepare_block_params(params, mxu_dtype=jnp.bfloat16)   # one-time prep
    out = jax.block_until_ready(block_forward(x, fused, seq_per_block=1))
    ref = reference_block(x, params)

    assert out.shape == (B, T, C)
    # tolerance covers bf16 MXU operands (f32 accumulation / f32 LN & softmax stats)
    # plus the approx-reciprocal softmax denominator (~2^-12 relative error)
    assert jnp.allclose(out, ref, atol=3e-2, rtol=3e-2), (
        "mismatch vs reference: max abs diff "
        f"{float(jnp.max(jnp.abs(out - ref)))}")

    print("KERNEL_OK")
</pallas_src>

<mosaic_0001>
module attributes {stable_mosaic.version = 11 : i64} {
  func.func @kernel(%arg0: i32, %arg1: memref<1x8x128xf32, #tpu.memory_space<vmem>>, %arg2: memref<128x384xbf16, #tpu.memory_space<vmem>>, %arg3: memref<4x32x128xbf16, #tpu.memory_space<vmem>>, %arg4: memref<128x512xbf16, #tpu.memory_space<vmem>>, %arg5: memref<1x512xf32, #tpu.memory_space<vmem>>, %arg6: memref<512x128xbf16, #tpu.memory_space<vmem>>, %arg7: memref<8x128xf32, #tpu.memory_space<vmem>>, %arg8: memref<1x8x128xf32, #tpu.memory_space<vmem>>) attributes {dimension_semantics = [#tpu.dimension_semantics<parallel>], iteration_bounds = array<i64: 2>, scalar_prefetch = 0 : i64, scratch_operands = 0 : i64, tpu.core_type = #tpu.core_type<tc>, window_params = [{transform_indices = @transform_0, window_bounds = array<i64: 1, 8, 128>}, {pipeline_mode = #tpu.pipeline_mode<synchronous>, transform_indices = @transform_1, window_bounds = array<i64: 128, 384>}, {pipeline_mode = #tpu.pipeline_mode<synchronous>, transform_indices = @transform_2, window_bounds = array<i64: 4, 32, 128>}, {pipeline_mode = #tpu.pipeline_mode<synchronous>, transform_indices = @transform_3, window_bounds = array<i64: 128, 512>}, {pipeline_mode = #tpu.pipeline_mode<synchronous>, transform_indices = @transform_4, window_bounds = array<i64: 1, 512>}, {pipeline_mode = #tpu.pipeline_mode<synchronous>, transform_indices = @transform_5, window_bounds = array<i64: 512, 128>}, {pipeline_mode = #tpu.pipeline_mode<synchronous>, transform_indices = @transform_6, window_bounds = array<i64: 8, 128>}, {transform_indices = @transform_7, window_bounds = array<i64: 1, 8, 128>}]} {
    %c0 = arith.constant 0 : index
    %c0_0 = arith.constant 0 : index
    %c0_1 = arith.constant 0 : index
    %0 = vector.load %arg1[%c0, %c0_0, %c0_1] : memref<1x8x128xf32, #tpu.memory_space<vmem>>, vector<1x8x128xf32>
    %1 = vector.shape_cast %0 : vector<1x8x128xf32> to vector<8x128xf32>
    %c0_2 = arith.constant 0 : index
    %c0_3 = arith.constant 0 : index
    %2 = vector.load %arg7[%c0_2, %c0_3] : memref<8x128xf32, #tpu.memory_space<vmem>>, vector<8x128xf32>
    %3 = vector.extract_strided_slice %2 {offsets = [0, 0], sizes = [1, 128], strides = [1, 1]} : vector<8x128xf32> to vector<1x128xf32>
    %4 = vector.extract_strided_slice %2 {offsets = [1, 0], sizes = [1, 128], strides = [1, 1]} : vector<8x128xf32> to vector<1x128xf32>
    %5 = vector.extract_strided_slice %2 {offsets = [2, 0], sizes = [1, 128], strides = [1, 1]} : vector<8x128xf32> to vector<1x128xf32>
    %6 = vector.extract_strided_slice %2 {offsets = [3, 0], sizes = [1, 128], strides = [1, 1]} : vector<8x128xf32> to vector<1x128xf32>
    %7 = vector.extract_strided_slice %2 {offsets = [4, 0], sizes = [1, 128], strides = [1, 1]} : vector<8x128xf32> to vector<1x128xf32>
    %8 = vector.extract_strided_slice %2 {offsets = [5, 0], sizes = [1, 128], strides = [1, 1]} : vector<8x128xf32> to vector<1x128xf32>
    %9 = arith.truncf %1 : vector<8x128xf32> to vector<8x128xbf16>
    %c0_4 = arith.constant 0 : index
    %c0_5 = arith.constant 0 : index
    %10 = vector.load %arg2[%c0_4, %c0_5] : memref<128x384xbf16, #tpu.memory_space<vmem>>, vector<128x384xbf16>
    %cst = arith.constant dense<0.000000e+00> : vector<8x384xf32>
    %11 = tpu.matmul %9, %10, %cst {dimension_numbers = #tpu.dot_dimension_numbers<[1], [0], [0], [1], [0, 0, 1, 1], [], []>} : vector<8x128xbf16>, vector<128x384xbf16>, vector<8x384xf32> -> vector<8x384xf32>
    %12 = tpu.iota {dimensions = array<i32: 0>} : vector<8x8xi32>
    %13 = tpu.iota {dimensions = array<i32: 1>} : vector<8x8xi32>
    %14 = arith.cmpi sge, %12, %13 : vector<8x8xi32>
    %cst_6 = arith.constant 0.000000e+00 : f32
    %cst_7 = arith.constant -1.000000e+30 : f32
    %15 = vector.broadcast %cst_6 : f32 to vector<8x8xf32>
    %16 = vector.broadcast %cst_7 : f32 to vector<8x8xf32>
    %17 = arith.select %14, %15, %16 : vector<8x8xi1>, vector<8x8xf32>
    %18 = vector.shape_cast %17 : vector<8x8xf32> to vector<1x8x8xf32>
    %cst_8 = arith.constant 0.000000e+00 : f32
    %19 = vector.broadcast %cst_8 : f32 to vector<8x128xf32>
    %20 = vector.extract_strided_slice %11 {offsets = [0, 0], sizes = [8, 32], strides = [1, 1]} : vector<8x384xf32> to vector<8x32xf32>
    %21 = vector.shape_cast %20 : vector<8x32xf32> to vector<1x8x32xf32>
    %22 = arith.truncf %21 : vector<1x8x32xf32> to vector<1x8x32xbf16>
    %23 = vector.extract_strided_slice %11 {offsets = [0, 128], sizes = [8, 32], strides = [1, 1]} : vector<8x384xf32> to vector<8x32xf32>
    %24 = vector.shape_cast %23 : vector<8x32xf32> to vector<1x8x32xf32>
    %25 = arith.truncf %24 : vector<1x8x32xf32> to vector<1x8x32xbf16>
    %26 = vector.extract_strided_slice %11 {offsets = [0, 256], sizes = [8, 32], strides = [1, 1]} : vector<8x384xf32> to vector<8x32xf32>
    %27 = vector.shape_cast %26 : vector<8x32xf32> to vector<1x8x32xf32>
    %28 = arith.truncf %27 : vector<1x8x32xf32> to vector<1x8x32xbf16>
    "tpu.trace_start"() <{level = 10 : i32, message = "bqd,bkd->bqk"}> : () -> ()
    %cst_9 = arith.constant dense<0.000000e+00> : vector<1x8x8xf32>
    %29 = tpu.matmul %22, %25, %cst_9 {dimension_numbers = #tpu.dot_dimension_numbers<[2], [2], [1], [1], [0, 0, 0, 1, 1, 1], [0], [0]>} : vector<1x8x32xbf16>, vector<1x8x32xbf16>, vector<1x8x8xf32> -> vector<1x8x8xf32>
    "tpu.trace_stop"() : () -> ()
    %30 = arith.addf %29, %18 : vector<1x8x8xf32>
    %cst_10 = arith.constant dense<0xFF800000> : vector<1x8xf32>
    %31 = vector.multi_reduction <maximumf>, %30, %cst_10 [2] : vector<1x8x8xf32> to vector<1x8xf32>
    %32 = vector.shape_cast %31 : vector<1x8xf32> to vector<1x8x1xf32>
    %33 = vector.broadcast %32 : vector<1x8x1xf32> to vector<1x8x8xf32>
    %34 = arith.subf %30, %33 : vector<1x8x8xf32>
    %35 = math.exp %34 : vector<1x8x8xf32>
    %cst_11 = arith.constant dense<0.000000e+00> : vector<1x8xf32>
    %36 = vector.multi_reduction <add>, %35, %cst_11 [2] : vector<1x8x8xf32> to vector<1x8xf32>
    %37 = vector.shape_cast %36 : vector<1x8xf32> to vector<1x8x1xf32>
    %38 = tpu.reciprocal %37 {approx = true} : vector<1x8x1xf32> -> vector<1x8x1xf32>
    %39 = vector.broadcast %38 : vector<1x8x1xf32> to vector<1x8x8xf32>
    %40 = arith.mulf %35, %39 : vector<1x8x8xf32>
    %41 = arith.truncf %40 : vector<1x8x8xf32> to vector<1x8x8xbf16>
    "tpu.trace_start"() <{level = 10 : i32, message = "bqk,bkd->bqd"}> : () -> ()
    %cst_12 = arith.constant dense<0.000000e+00> : vector<1x8x32xf32>
    %42 = tpu.matmul %41, %28, %cst_12 {dimension_numbers = #tpu.dot_dimension_numbers<[2], [1], [1], [2], [0, 0, 0, 1, 1, 2], [0], [0]>} : vector<1x8x8xbf16>, vector<1x8x32xbf16>, vector<1x8x32xf32> -> vector<1x8x32xf32>
    "tpu.trace_stop"() : () -> ()
    %43 = vector.shape_cast %42 : vector<1x8x32xf32> to vector<8x32xf32>
    %44 = arith.truncf %43 : vector<8x32xf32> to vector<8x32xbf16>
    %c0_13 = arith.constant 0 : index
    %c0_14 = arith.constant 0 : index
    %c0_15 = arith.constant 0 : index
    %45 = vector.load %arg3[%c0_13, %c0_14, %c0_15] : memref<4x32x128xbf16, #tpu.memory_space<vmem>>, vector<1x32x128xbf16>
    %46 = vector.shape_cast %45 : vector<1x32x128xbf16> to vector<32x128xbf16>
    %cst_16 = arith.constant dense<0.000000e+00> : vector<8x128xf32>
    %47 = tpu.matmul %44, %46, %cst_16 {dimension_numbers = #tpu.dot_dimension_numbers<[1], [0], [0], [1], [0, 0, 1, 1], [], []>} : vector<8x32xbf16>, vector<32x128xbf16>, vector<8x128xf32> -> vector<8x128xf32>
    %48 = arith.addf %19, %47 : vector<8x128xf32>
    %49 = vector.extract_strided_slice %11 {offsets = [0, 32], sizes = [8, 32], strides = [1, 1]} : vector<8x384xf32> to vector<8x32xf32>
    %50 = vector.shape_cast %49 : vector<8x32xf32> to vector<1x8x32xf32>
    %51 = arith.truncf %50 : vector<1x8x32xf32> to vector<1x8x32xbf16>
    %52 = vector.extract_strided_slice %11 {offsets = [0, 160], sizes = [8, 32], strides = [1, 1]} : vector<8x384xf32> to vector<8x32xf32>
    %53 = vector.shape_cast %52 : vector<8x32xf32> to vector<1x8x32xf32>
    %54 = arith.truncf %53 : vector<1x8x32xf32> to vector<1x8x32xbf16>
    %55 = vector.extract_strided_slice %11 {offsets = [0, 288], sizes = [8, 32], strides = [1, 1]} : vector<8x384xf32> to vector<8x32xf32>
    %56 = vector.shape_cast %55 : vector<8x32xf32> to vector<1x8x32xf32>
    %57 = arith.truncf %56 : vector<1x8x32xf32> to vector<1x8x32xbf16>
    "tpu.trace_start"() <{level = 10 : i32, message = "bqd,bkd->bqk"}> : () -> ()
    %cst_17 = arith.constant dense<0.000000e+00> : vector<1x8x8xf32>
    %58 = tpu.matmul %51, %54, %cst_17 {dimension_numbers = #tpu.dot_dimension_numbers<[2], [2], [1], [1], [0, 0, 0, 1, 1, 1], [0], [0]>} : vector<1x8x32xbf16>, vector<1x8x32xbf16>, vector<1x8x8xf32> -> vector<1x8x8xf32>
    "tpu.trace_stop"() : () -> ()
    %59 = arith.addf %58, %18 : vector<1x8x8xf32>
    %cst_18 = arith.constant dense<0xFF800000> : vector<1x8xf32>
    %60 = vector.multi_reduction <maximumf>, %59, %cst_18 [2] : vector<1x8x8xf32> to vector<1x8xf32>
    %61 = vector.shape_cast %60 : vector<1x8xf32> to vector<1x8x1xf32>
    %62 = vector.broadcast %61 : vector<1x8x1xf32> to vector<1x8x8xf32>
    %63 = arith.subf %59, %62 : vector<1x8x8xf32>
    %64 = math.exp %63 : vector<1x8x8xf32>
    %cst_19 = arith.constant dense<0.000000e+00> : vector<1x8xf32>
    %65 = vector.multi_reduction <add>, %64, %cst_19 [2] : vector<1x8x8xf32> to vector<1x8xf32>
    %66 = vector.shape_cast %65 : vector<1x8xf32> to vector<1x8x1xf32>
    %67 = tpu.reciprocal %66 {approx = true} : vector<1x8x1xf32> -> vector<1x8x1xf32>
    %68 = vector.broadcast %67 : vector<1x8x1xf32> to vector<1x8x8xf32>
    %69 = arith.mulf %64, %68 : vector<1x8x8xf32>
    %70 = arith.truncf %69 : vector<1x8x8xf32> to vector<1x8x8xbf16>
    "tpu.trace_start"() <{level = 10 : i32, message = "bqk,bkd->bqd"}> : () -> ()
    %cst_20 = arith.constant dense<0.000000e+00> : vector<1x8x32xf32>
    %71 = tpu.matmul %70, %57, %cst_20 {dimension_numbers = #tpu.dot_dimension_numbers<[2], [1], [1], [2], [0, 0, 0, 1, 1, 2], [0], [0]>} : vector<1x8x8xbf16>, vector<1x8x32xbf16>, vector<1x8x32xf32> -> vector<1x8x32xf32>
    "tpu.trace_stop"() : () -> ()
    %72 = vector.shape_cast %71 : vector<1x8x32xf32> to vector<8x32xf32>
    %73 = arith.truncf %72 : vector<8x32xf32> to vector<8x32xbf16>
    %c1 = arith.constant 1 : index
    %c0_21 = arith.constant 0 : index
    %c0_22 = arith.constant 0 : index
    %74 = vector.load %arg3[%c1, %c0_21, %c0_22] : memref<4x32x128xbf16, #tpu.memory_space<vmem>>, vector<1x32x128xbf16>
    %75 = vector.shape_cast %74 : vector<1x32x128xbf16> to vector<32x128xbf16>
    %cst_23 = arith.constant dense<0.000000e+00> : vector<8x128xf32>
    %76 = tpu.matmul %73, %75, %cst_23 {dimension_numbers = #tpu.dot_dimension_numbers<[1], [0], [0], [1], [0, 0, 1, 1], [], []>} : vector<8x32xbf16>, vector<32x128xbf16>, vector<8x128xf32> -> vector<8x128xf32>
    %77 = arith.addf %48, %76 : vector<8x128xf32>
    %78 = vector.extract_strided_slice %11 {offsets = [0, 64], sizes = [8, 32], strides = [1, 1]} : vector<8x384xf32> to vector<8x32xf32>
    %79 = vector.shape_cast %78 : vector<8x32xf32> to vector<1x8x32xf32>
    %80 = arith.truncf %79 : vector<1x8x32xf32> to vector<1x8x32xbf16>
    %81 = vector.extract_strided_slice %11 {offsets = [0, 192], sizes = [8, 32], strides = [1, 1]} : vector<8x384xf32> to vector<8x32xf32>
    %82 = vector.shape_cast %81 : vector<8x32xf32> to vector<1x8x32xf32>
    %83 = arith.truncf %82 : vector<1x8x32xf32> to vector<1x8x32xbf16>
    %84 = vector.extract_strided_slice %11 {offsets = [0, 320], sizes = [8, 32], strides = [1, 1]} : vector<8x384xf32> to vector<8x32xf32>
    %85 = vector.shape_cast %84 : vector<8x32xf32> to vector<1x8x32xf32>
    %86 = arith.truncf %85 : vector<1x8x32xf32> to vector<1x8x32xbf16>
    "tpu.trace_start"() <{level = 10 : i32, message = "bqd,bkd->bqk"}> : () -> ()
    %cst_24 = arith.constant dense<0.000000e+00> : vector<1x8x8xf32>
    %87 = tpu.matmul %80, %83, %cst_24 {dimension_numbers = #tpu.dot_dimension_numbers<[2], [2], [1], [1], [0, 0, 0, 1, 1, 1], [0], [0]>} : vector<1x8x32xbf16>, vector<1x8x32xbf16>, vector<1x8x8xf32> -> vector<1x8x8xf32>
    "tpu.trace_stop"() : () -> ()
    %88 = arith.addf %87, %18 : vector<1x8x8xf32>
    %cst_25 = arith.constant dense<0xFF800000> : vector<1x8xf32>
    %89 = vector.multi_reduction <maximumf>, %88, %cst_25 [2] : vector<1x8x8xf32> to vector<1x8xf32>
    %90 = vector.shape_cast %89 : vector<1x8xf32> to vector<1x8x1xf32>
    %91 = vector.broadcast %90 : vector<1x8x1xf32> to vector<1x8x8xf32>
    %92 = arith.subf %88, %91 : vector<1x8x8xf32>
    %93 = math.exp %92 : vector<1x8x8xf32>
    %cst_26 = arith.constant dense<0.000000e+00> : vector<1x8xf32>
    %94 = vector.multi_reduction <add>, %93, %cst_26 [2] : vector<1x8x8xf32> to vector<1x8xf32>
    %95 = vector.shape_cast %94 : vector<1x8xf32> to vector<1x8x1xf32>
    %96 = tpu.reciprocal %95 {approx = true} : vector<1x8x1xf32> -> vector<1x8x1xf32>
    %97 = vector.broadcast %96 : vector<1x8x1xf32> to vector<1x8x8xf32>
    %98 = arith.mulf %93, %97 : vector<1x8x8xf32>
    %99 = arith.truncf %98 : vector<1x8x8xf32> to vector<1x8x8xbf16>
    "tpu.trace_start"() <{level = 10 : i32, message = "bqk,bkd->bqd"}> : () -> ()
    %cst_27 = arith.constant dense<0.000000e+00> : vector<1x8x32xf32>
    %100 = tpu.matmul %99, %86, %cst_27 {dimension_numbers = #tpu.dot_dimension_numbers<[2], [1], [1], [2], [0, 0, 0, 1, 1, 2], [0], [0]>} : vector<1x8x8xbf16>, vector<1x8x32xbf16>, vector<1x8x32xf32> -> vector<1x8x32xf32>
    "tpu.trace_stop"() : () -> ()
    %101 = vector.shape_cast %100 : vector<1x8x32xf32> to vector<8x32xf32>
    %102 = arith.truncf %101 : vector<8x32xf32> to vector<8x32xbf16>
    %c2 = arith.constant 2 : index
    %c0_28 = arith.constant 0 : index
    %c0_29 = arith.constant 0 : index
    %103 = vector.load %arg3[%c2, %c0_28, %c0_29] : memref<4x32x128xbf16, #tpu.memory_space<vmem>>, vector<1x32x128xbf16>
    %104 = vector.shape_cast %103 : vector<1x32x128xbf16> to vector<32x128xbf16>
    %cst_30 = arith.constant dense<0.000000e+00> : vector<8x128xf32>
    %105 = tpu.matmul %102, %104, %cst_30 {dimension_numbers = #tpu.dot_dimension_numbers<[1], [0], [0], [1], [0, 0, 1, 1], [], []>} : vector<8x32xbf16>, vector<32x128xbf16>, vector<8x128xf32> -> vector<8x128xf32>
    %106 = arith.addf %77, %105 : vector<8x128xf32>
    %107 = vector.extract_strided_slice %11 {offsets = [0, 96], sizes = [8, 32], strides = [1, 1]} : vector<8x384xf32> to vector<8x32xf32>
    %108 = vector.shape_cast %107 : vector<8x32xf32> to vector<1x8x32xf32>
    %109 = arith.truncf %108 : vector<1x8x32xf32> to vector<1x8x32xbf16>
    %110 = vector.extract_strided_slice %11 {offsets = [0, 224], sizes = [8, 32], strides = [1, 1]} : vector<8x384xf32> to vector<8x32xf32>
    %111 = vector.shape_cast %110 : vector<8x32xf32> to vector<1x8x32xf32>
    %112 = arith.truncf %111 : vector<1x8x32xf32> to vector<1x8x32xbf16>
    %113 = vector.extract_strided_slice %11 {offsets = [0, 352], sizes = [8, 32], strides = [1, 1]} : vector<8x384xf32> to vector<8x32xf32>
    %114 = vector.shape_cast %113 : vector<8x32xf32> to vector<1x8x32xf32>
    %115 = arith.truncf %114 : vector<1x8x32xf32> to vector<1x8x32xbf16>
    "tpu.trace_start"() <{level = 10 : i32, message = "bqd,bkd->bqk"}> : () -> ()
    %cst_31 = arith.constant dense<0.000000e+00> : vector<1x8x8xf32>
    %116 = tpu.matmul %109, %112, %cst_31 {dimension_numbers = #tpu.dot_dimension_numbers<[2], [2], [1], [1], [0, 0, 0, 1, 1, 1], [0], [0]>} : vector<1x8x32xbf16>, vector<1x8x32xbf16>, vector<1x8x8xf32> -> vector<1x8x8xf32>
    "tpu.trace_stop"() : () -> ()
    %117 = arith.addf %116, %18 : vector<1x8x8xf32>
    %cst_32 = arith.constant dense<0xFF800000> : vector<1x8xf32>
    %118 = vector.multi_reduction <maximumf>, %117, %cst_32 [2] : vector<1x8x8xf32> to vector<1x8xf32>
    %119 = vector.shape_cast %118 : vector<1x8xf32> to vector<1x8x1xf32>
    %120 = vector.broadcast %119 : vector<1x8x1xf32> to vector<1x8x8xf32>
    %121 = arith.subf %117, %120 : vector<1x8x8xf32>
    %122 = math.exp %121 : vector<1x8x8xf32>
    %cst_33 = arith.constant dense<0.000000e+00> : vector<1x8xf32>
    %123 = vector.multi_reduction <add>, %122, %cst_33 [2] : vector<1x8x8xf32> to vector<1x8xf32>
    %124 = vector.shape_cast %123 : vector<1x8xf32> to vector<1x8x1xf32>
    %125 = tpu.reciprocal %124 {approx = true} : vector<1x8x1xf32> -> vector<1x8x1xf32>
    %126 = vector.broadcast %125 : vector<1x8x1xf32> to vector<1x8x8xf32>
    %127 = arith.mulf %122, %126 : vector<1x8x8xf32>
    %128 = arith.truncf %127 : vector<1x8x8xf32> to vector<1x8x8xbf16>
    "tpu.trace_start"() <{level = 10 : i32, message = "bqk,bkd->bqd"}> : () -> ()
    %cst_34 = arith.constant dense<0.000000e+00> : vector<1x8x32xf32>
    %129 = tpu.matmul %128, %115, %cst_34 {dimension_numbers = #tpu.dot_dimension_numbers<[2], [1], [1], [2], [0, 0, 0, 1, 1, 2], [0], [0]>} : vector<1x8x8xbf16>, vector<1x8x32xbf16>, vector<1x8x32xf32> -> vector<1x8x32xf32>
    "tpu.trace_stop"() : () -> ()
    %130 = vector.shape_cast %129 : vector<1x8x32xf32> to vector<8x32xf32>
    %131 = arith.truncf %130 : vector<8x32xf32> to vector<8x32xbf16>
    %c3 = arith.constant 3 : index
    %c0_35 = arith.constant 0 : index
    %c0_36 = arith.constant 0 : index
    %132 = vector.load %arg3[%c3, %c0_35, %c0_36] : memref<4x32x128xbf16, #tpu.memory_space<vmem>>, vector<1x32x128xbf16>
    %133 = vector.shape_cast %132 : vector<1x32x128xbf16> to vector<32x128xbf16>
    %cst_37 = arith.constant dense<0.000000e+00> : vector<8x128xf32>
    %134 = tpu.matmul %131, %133, %cst_37 {dimension_numbers = #tpu.dot_dimension_numbers<[1], [0], [0], [1], [0, 0, 1, 1], [], []>} : vector<8x32xbf16>, vector<32x128xbf16>, vector<8x128xf32> -> vector<8x128xf32>
    %135 = arith.addf %106, %134 : vector<8x128xf32>
    %136 = vector.broadcast %3 : vector<1x128xf32> to vector<8x128xf32>
    %137 = arith.addf %135, %136 : vector<8x128xf32>
    %138 = arith.addf %1, %137 : vector<8x128xf32>
    %cst_38 = arith.constant dense<0.000000e+00> : vector<8xf32>
    %139 = vector.multi_reduction <add>, %138, %cst_38 [1] : vector<8x128xf32> to vector<8xf32>
    %140 = vector.shape_cast %139 : vector<8xf32> to vector<8x1xf32>
    %cst_39 = arith.constant 1.280000e+02 : f32
    %141 = vector.broadcast %cst_39 : f32 to vector<8x1xf32>
    %142 = arith.divf %140, %141 : vector<8x1xf32>
    %143 = vector.broadcast %142 : vector<8x1xf32> to vector<8x128xf32>
    %144 = arith.subf %138, %143 : vector<8x128xf32>
    %145 = arith.mulf %144, %144 : vector<8x128xf32>
    %cst_40 = arith.constant dense<0.000000e+00> : vector<8xf32>
    %146 = vector.multi_reduction <add>, %145, %cst_40 [1] : vector<8x128xf32> to vector<8xf32>
    %147 = vector.shape_cast %146 : vector<8xf32> to vector<8x1xf32>
    %cst_41 = arith.constant 1.280000e+02 : f32
    %148 = vector.broadcast %cst_41 : f32 to vector<8x1xf32>
    %149 = arith.divf %147, %148 : vector<8x1xf32>
    %cst_42 = arith.constant 9.99999974E-6 : f32
    %150 = vector.broadcast %cst_42 : f32 to vector<8x1xf32>
    %151 = arith.addf %149, %150 : vector<8x1xf32>
    %152 = math.rsqrt %151 : vector<8x1xf32>
    %153 = vector.broadcast %152 : vector<8x1xf32> to vector<8x128xf32>
    %154 = arith.mulf %144, %153 : vector<8x128xf32>
    %155 = vector.broadcast %4 : vector<1x128xf32> to vector<8x128xf32>
    %156 = arith.mulf %154, %155 : vector<8x128xf32>
    %157 = vector.broadcast %5 : vector<1x128xf32> to vector<8x128xf32>
    %158 = arith.addf %156, %157 : vector<8x128xf32>
    %159 = arith.truncf %158 : vector<8x128xf32> to vector<8x128xbf16>
    %c0_43 = arith.constant 0 : index
    %c0_44 = arith.constant 0 : index
    %160 = vector.load %arg4[%c0_43, %c0_44] : memref<128x512xbf16, #tpu.memory_space<vmem>>, vector<128x512xbf16>
    %cst_45 = arith.constant dense<0.000000e+00> : vector<8x512xf32>
    %161 = tpu.matmul %159, %160, %cst_45 {dimension_numbers = #tpu.dot_dimension_numbers<[1], [0], [0], [1], [0, 0, 1, 1], [], []>} : vector<8x128xbf16>, vector<128x512xbf16>, vector<8x512xf32> -> vector<8x512xf32>
    %c0_46 = arith.constant 0 : index
    %c0_47 = arith.constant 0 : index
    %162 = vector.load %arg5[%c0_46, %c0_47] : memref<1x512xf32, #tpu.memory_space<vmem>>, vector<1x512xf32>
    %163 = vector.broadcast %162 : vector<1x512xf32> to vector<8x512xf32>
    %164 = arith.addf %161, %163 : vector<8x512xf32>
    %cst_48 = arith.constant 0.000000e+00 : f32
    %165 = vector.broadcast %cst_48 : f32 to vector<8x512xf32>
    %166 = arith.maximumf %164, %165 : vector<8x512xf32>
    %167 = arith.truncf %166 : vector<8x512xf32> to vector<8x512xbf16>
    %c0_49 = arith.constant 0 : index
    %c0_50 = arith.constant 0 : index
    %168 = vector.load %arg6[%c0_49, %c0_50] : memref<512x128xbf16, #tpu.memory_space<vmem>>, vector<512x128xbf16>
    %cst_51 = arith.constant dense<0.000000e+00> : vector<8x128xf32>
    %169 = tpu.matmul %167, %168, %cst_51 {dimension_numbers = #tpu.dot_dimension_numbers<[1], [0], [0], [1], [0, 0, 1, 1], [], []>} : vector<8x512xbf16>, vector<512x128xbf16>, vector<8x128xf32> -> vector<8x128xf32>
    %170 = vector.broadcast %6 : vector<1x128xf32> to vector<8x128xf32>
    %171 = arith.addf %169, %170 : vector<8x128xf32>
    %172 = arith.addf %158, %171 : vector<8x128xf32>
    %cst_52 = arith.constant dense<0.000000e+00> : vector<8xf32>
    %173 = vector.multi_reduction <add>, %172, %cst_52 [1] : vector<8x128xf32> to vector<8xf32>
    %174 = vector.shape_cast %173 : vector<8xf32> to vector<8x1xf32>
    %cst_53 = arith.constant 1.280000e+02 : f32
    %175 = vector.broadcast %cst_53 : f32 to vector<8x1xf32>
    %176 = arith.divf %174, %175 : vector<8x1xf32>
    %177 = vector.broadcast %176 : vector<8x1xf32> to vector<8x128xf32>
    %178 = arith.subf %172, %177 : vector<8x128xf32>
    %179 = arith.mulf %178, %178 : vector<8x128xf32>
    %cst_54 = arith.constant dense<0.000000e+00> : vector<8xf32>
    %180 = vector.multi_reduction <add>, %179, %cst_54 [1] : vector<8x128xf32> to vector<8xf32>
    %181 = vector.shape_cast %180 : vector<8xf32> to vector<8x1xf32>
    %cst_55 = arith.constant 1.280000e+02 : f32
    %182 = vector.broadcast %cst_55 : f32 to vector<8x1xf32>
    %183 = arith.divf %181, %182 : vector<8x1xf32>
    %cst_56 = arith.constant 9.99999974E-6 : f32
    %184 = vector.broadcast %cst_56 : f32 to vector<8x1xf32>
    %185 = arith.addf %183, %184 : vector<8x1xf32>
    %186 = math.rsqrt %185 : vector<8x1xf32>
    %187 = vector.broadcast %186 : vector<8x1xf32> to vector<8x128xf32>
    %188 = arith.mulf %178, %187 : vector<8x128xf32>
    %189 = vector.broadcast %7 : vector<1x128xf32> to vector<8x128xf32>
    %190 = arith.mulf %188, %189 : vector<8x128xf32>
    %191 = vector.broadcast %8 : vector<1x128xf32> to vector<8x128xf32>
    %192 = arith.addf %190, %191 : vector<8x128xf32>
    %193 = vector.shape_cast %192 : vector<8x128xf32> to vector<1x8x128xf32>
    %c0_57 = arith.constant 0 : index
    %c0_58 = arith.constant 0 : index
    %c0_59 = arith.constant 0 : index
    %194 = vector.load %arg8[%c0_57, %c0_58, %c0_59] : memref<1x8x128xf32, #tpu.memory_space<vmem>>, vector<1x8x128xf32>
    tpu.vector_store %arg8[%c0_57, %c0_58, %c0_59], %193 {strides = array<i32>} : memref<1x8x128xf32, #tpu.memory_space<vmem>>, vector<1x8x128xf32>,
    return
  }
  func.func @transform_0(%arg0: i32) -> (i32, i32, i32) {
    %c0_i32 = arith.constant 0 : i32
    %c0_i32_0 = arith.constant 0 : i32
    %c0_i32_1 = arith.constant 0 : i32
    return %arg0, %c0_i32, %c0_i32_0 : i32, i32, i32
  }
  func.func @transform_1(%arg0: i32) -> (i32, i32) {
    %c0_i32 = arith.constant 0 : i32
    %c0_i32_0 = arith.constant 0 : i32
    %c0_i32_1 = arith.constant 0 : i32
    return %c0_i32, %c0_i32_0 : i32, i32
  }
  func.func @transform_2(%arg0: i32) -> (i32, i32, i32) {
    %c0_i32 = arith.constant 0 : i32
    %c0_i32_0 = arith.constant 0 : i32
    %c0_i32_1 = arith.constant 0 : i32
    %c0_i32_2 = arith.constant 0 : i32
    return %c0_i32, %c0_i32_0, %c0_i32_1 : i32, i32, i32
  }
  func.func @transform_3(%arg0: i32) -> (i32, i32) {
    %c0_i32 = arith.constant 0 : i32
    %c0_i32_0 = arith.constant 0 : i32
    %c0_i32_1 = arith.constant 0 : i32
    return %c0_i32, %c0_i32_0 : i32, i32
  }
  func.func @transform_4(%arg0: i32) -> (i32, i32) {
    %c0_i32 = arith.constant 0 : i32
    %c0_i32_0 = arith.constant 0 : i32
    %c0_i32_1 = arith.constant 0 : i32
    return %c0_i32, %c0_i32_0 : i32, i32
  }
  func.func @transform_5(%arg0: i32) -> (i32, i32) {
    %c0_i32 = arith.constant 0 : i32
    %c0_i32_0 = arith.constant 0 : i32
    %c0_i32_1 = arith.constant 0 : i32
    return %c0_i32, %c0_i32_0 : i32, i32
  }
  func.func @transform_6(%arg0: i32) -> (i32, i32) {
    %c0_i32 = arith.constant 0 : i32
    %c0_i32_0 = arith.constant 0 : i32
    %c0_i32_1 = arith.constant 0 : i32
    return %c0_i32, %c0_i32_0 : i32, i32
  }
  func.func @transform_7(%arg0: i32) -> (i32, i32, i32) {
    %c0_i32 = arith.constant 0 : i32
    %c0_i32_0 = arith.constant 0 : i32
    %c0_i32_1 = arith.constant 0 : i32
    return %arg0, %c0_i32, %c0_i32_0 : i32, i32, i32
  }
}

</mosaic_0001>

<bundles_post_ra>
// kernel: tpu_custom_call.1
= control target key start
LH: loop header
LB: loop body
LE: loop exit
PB: predicated region body
PF: predicated region fallthrough
CT: control target
= control target key end

     0   :  { %s3005_s0 = inlined_call_operand.hbm [shape: f32[2,8,128], index: 0, kind: input, shape index: {}]   ;;  %s3006_s1 = inlined_call_operand.hbm [shape: bf16[128,384], index: 1, kind: input, shape index: {}]   ;;  %s3007_s2 = inlined_call_operand.hbm [shape: bf16[4,32,128], index: 2, kind: input, shape index: {}]   ;;  %s3008_s3 = inlined_call_operand.hbm [shape: bf16[128,512], index: 3, kind: input, shape index: {}]   ;;  %s3009_s4 = inlined_call_operand.hbm [shape: f32[1,512], index: 4, kind: input, shape index: {}]   ;;  %s3010_s5 = inlined_call_operand.hbm [shape: bf16[512,128], index: 5, kind: input, shape index: {}]   ;;  %s3011_s6 = inlined_call_operand.hbm [shape: f32[8,128], index: 6, kind: input, shape index: {}]   ;;  %s3012_s7 = inlined_call_operand.hbm [shape: f32[2,8,128], index: 7, kind: output, shape index: {}]  }
   0x1   :  { %3013 = sst [smem:[#allocation20_spill]] %s3006_s1 }
   0x2   :  { %3014 = sst [smem:[#allocation21_spill]] %s3007_s2 }
   0x3   :  { %12 = vsyncpa [#allocation3], 0 }
   0x4   :  { %14 = vsyncpa [#allocation3 + $0x1], 0 }
   0x5   :  { %15 = vsyncpa [#allocation6], 0 }
   0x6   :  { %16 = vsyncpa [#allocation9], 0 }
   0x7   :  { %17 = vsyncpa [#allocation12], 0 }
   0x8   :  { %18 = vsyncpa [#allocation4], 0 }
   0x9   :  { %20 = vsyncpa [#allocation4 + $0x1], 0  ;;  %s2748_s24 = smov 0   ;;  %s2750_s25 = smov 0  }
   0xa   :  { %s2752_s26 = smov 0   ;;  %s2754_s27 = smov 0  }
   0xb LB: > { %s3015_s1 = sld [smem:[#allocation20_spill]]  ;;  %s2772_s8 = sadd.s32 4294967295, %s2689_s27   ;;  %s2689_s27 = sphi %s2754_s27, %s3028_s27   ;;  %s2685_s26 = sphi %s2752_s26, %s3027_s26   ;;  %s2681_s25 = sphi %s2750_s25, %s3026_s25   ;;  %s2677_s24 = sphi %s2748_s24, %s3025_s24  }
   0xc   : > { %p1746_p0 = scmp.ge.s32.totalorder %s2689_s27, 1  ;;  %p47_p1 = scmp.eq.s32.totalorder %s2772_s8, 0 }
   0xd   : > { %p209_p2 = scmp.lt.s32.totalorder %s2689_s27, 3  ;;  %s2691_s10 = smov [#allocation5]  }
   0xe   : > { %s222_s11 = sshll.u32 %s2691_s10, 4  ;;  %s248_s14 = sshll.u32 %s3008_s3, 4  ;;  %s223_s11 = int_to_ptr.vmem [resolvable:$true] %s222_s11  ;;  %s249_s14 = int_to_ptr.hbm [resolvable:$true] %s248_s14 }
   0xf   : > { %p2777_p3 = pnand %p1746_p0, %p209_p2  ;;  %s2692_s16 = smov [#allocation8]  }
  0x10   : > { %s250_s17 = sshll.u32 %s2692_s16, 4  ;;  %s2693_s18 = smov 192   ;;  %s251_s17 = int_to_ptr.vmem [resolvable:$true] %s250_s17 }
  0x11   : > { %s220_s30 = sshll.u32 %s3015_s1, 4  ;;  %p2289_p4 = pneg %p2777_p3  ;;  %s221_s30 = int_to_ptr.hbm [resolvable:$true] %s220_s30 }
  0x12   : > { %s2694_s19 = smov 12   ;;  %s2695_s20 = smov 256  }
  0x13   : > { %p2789_p6 = pnand %p2289_p4, %p47_p1  ;;  %s2696_s21 = smov 16  }
  0x14   : > { %s274_s28 = sshll.u32 %s3010_s5, 4  ;;  %s2697_s29 = smov [#allocation11]   ;;  %s275_s28 = int_to_ptr.hbm [resolvable:$true] %s274_s28 }
  0x15   : > { %2292 = dma.hbm_to_vmem [thread:$0]  (!%p2789_p6), %s221_s30, 3072, %s223_s11, [#allocation6], %s2693_s18, %s2693_s18, %s2694_s19  }
  0x16   : > { %2298 = dma.hbm_to_vmem [thread:$0]  (!%p2789_p6), %s249_s14, 4096, %s251_s17, [#allocation9], %s2695_s20, %s2695_s20, %s2696_s21  }
  0x17   : > { %s276_s10 = sshll.u32 %s2697_s29, 4  ;;  %s3018_s2 = sld [smem:[#allocation21_spill]]  ;;  %s277_s10 = int_to_ptr.vmem [resolvable:$true] %s276_s10 }
  0x18   : > { %s2698_s30 = smov 64   ;;  %s2699_s11 = smov 4  }
  0x19   : > { %2304 = dma.hbm_to_vmem [thread:$0]  (!%p2789_p6), %s275_s28, 4096, %s277_s10, [#allocation12], %s2698_s30, %s2698_s30, %s2699_s11  }
  0x1a   : > { %s2700_s14 = smov [#allocation7]   ;;  %s263_s20 = sshll.u32 %s3009_s4, 4  ;;  %s264_s20 = int_to_ptr.hbm [resolvable:$true] %s263_s20 }
  0x1b   : > { %s236_s17 = sshll.u32 %s2700_s14, 4  ;;  %s289_s23 = sshll.u32 %s3011_s6, 4  ;;  %s237_s17 = int_to_ptr.vmem [resolvable:$true] %s236_s17  ;;  %s290_s23 = int_to_ptr.hbm [resolvable:$true] %s289_s23 }
  0x1c   : > { %s2701_s28 = smov [#allocation10]   ;;  %s2702_s10 = smov [#allocation13]  }
  0x1d   : > { %s234_s16 = sshll.u32 %s3018_s2, 4  ;;  %s265_s29 = sshll.u32 %s2701_s28, 4  ;;  %s235_s16 = int_to_ptr.hbm [resolvable:$true] %s234_s16  ;;  %s266_s29 = int_to_ptr.vmem [resolvable:$true] %s265_s29 }
  0x1e   : > { %2295 = dma.hbm_to_vmem [thread:$0]  (!%p2789_p6), %s235_s16, 1024, %s237_s17, [#allocation6], %s2698_s30, %s2698_s30, %s2699_s11  }
  0x1f   : > { %2301 = dma.hbm_to_vmem [thread:$0]  (!%p2789_p6), %s264_s20, 64, %s266_s29, [#allocation9]  }
  0x20   : > { %s291_s12 = sshll.u32 %s2702_s10, 4  ;;  %s1745_s13 = sadd.s32 4294967294, %s2689_s27   ;;  %s292_s12 = int_to_ptr.vmem [resolvable:$true] %s291_s12 }
  0x21   : > { %2307 = dma.hbm_to_vmem [thread:$0]  (!%p2789_p6), %s290_s23, 128, %s292_s12, [#allocation12]  }
  0x22   : > { %s2819_s16 = sadd.s32 1, %s2689_s27   ;;  %s33_s11 = sadd.s32 1, %s2685_s26 }
  0x23   : > { %s30_s30 = ssub.s32 %s2689_s27, %s2819_s16  ;;  %p40_p8 = scmp.ne.s32.totalorder %s2685_s26, %s2681_s25 }
  0x24   : > { %p31_p7 = scmp.eq.s32.totalorder %s30_s30, 0  ;;  %p41_p9 = scmp.eq.s32.totalorder %s2689_s27, 0 }
  0x25   : > { %p46_p10 = scmp.ne.s32.totalorder %s2681_s25, %s2677_s24  ;;  %p196_p13 = scmp.eq.s32.totalorder %s2772_s8, 1 }
  0x26   : > { %s2830_s14 = scalar_select %p31_p7, %s2685_s26, %s33_s11  }
  0x27   : > { %p2832_p11 = por %p41_p9, %p40_p8  ;;  %p2838_p12 = por %p47_p1, %p46_p10 }
  0x28   : > { %p202_p0 = scmp.eq.s32.totalorder %s1745_s13, 1  ;;  %p2322_p2 = scmp.lt.s32.totalorder %s2689_s27, 2 }
  0x29   : > { %s302_s18 = sand.u32 1, %s2685_s26   ;;  %p2845_p4 = por %p196_p13, %p40_p8 }
  0x2a   : > { %p2849_p6 = por %p202_p0, %p46_p10  ;;  %s1754_s21 = sshll.u32 %s302_s18, 3 }
  0x2b   : > { %s1755_s22 = sshll.u32 %s2689_s27, 3  ;;  %s306_s10 = scalar_lea.vmem [#allocation2], %s1754_s21 }
  0x2c   : > { %s310_s29 = scalar_lea.hbm %s3005_s0, %s1755_s22  ;;  %s314_s12 = sshll.u32 %s306_s10, 4  ;;  %s315_s12 = int_to_ptr.vmem [resolvable:$true] %s314_s12 }
  0x2d   : > { %s312_s30 = sshll.u32 %s310_s29, 4  ;;  %p2859_p7 = pnand %p2322_p2, %p2832_p11  ;;  %s313_s30 = int_to_ptr.hbm [resolvable:$true] %s312_s30 }
  0x2e   : > { %s303_s11 = scalar_lea.sflag [#allocation3], %s302_s18  ;;  %s2581_s1 = sshra.s32 %s313_s30, 4  ;;  %s2582_s1 = int_to_ptr.hbm [resolvable:$true] %s2581_s1 }
  0x2f   : > { %s2583_s2 = scalar_lea.hbm %s2582_s1, 8  ;;  %p2585_p9 = pneg %p2859_p7 }
  0x30   : > { %p2584_p8 = scmp.ne.s32.totalorder %s2582_s1, %s2583_s2  ;;  %s2588_s23 = scalar_lea.hbm %s3005_s0, 16 }
  0x31   : > { %p2589_p11 = scmp.lt.s32.totalorder %s2582_s1, %s3005_s0  ;;  %p2590_p0 = scmp.lt.s32.totalorder %s2588_s23, %s2583_s2 }
  0x32   : > { %p2586_p10 = pnand %p2585_p9, %p2584_p8 }
  0x33   : > { %p2591_p2 = por %p2590_p0, %p2589_p11 }
  0x34   : > { %p2587_p13 = pneg %p2586_p10 }
  0x36   : > { %p2592_p5 = pnand %p2591_p2, %p2587_p13 }
  0x38   : > { %2595 = shalt.err (!%p2592_p5)
}
  0x39   : > { %2311 = dma.hbm_to_vmem [thread:$0]  (!%p2859_p7), %s313_s30, 128, %s315_s12, %s303_s11  }
  0x3a   : > { %323 = sbr.rel (%p2777_p3) target bundleno = 2265 (0x8d9), region = 48  ;;  %s2876_s18 = sand.u32 (!%p2777_p3), 1, %s2681_s25  }
  0x3b   : > { %s1757_s29 = sshll.u32 (!%p2777_p3), %s2876_s18, 3  ;;  %s326_s10 = scalar_lea.sflag (!%p2777_p3), [#allocation3], %s2876_s18 }
  0x3c   : > { %s2882_s1 = scalar_lea.vmem (!%p2777_p3), [#allocation2], %s1757_s29 }
  0x3f   : > { %2656 = dma.done.wait (%p2838_p12), %s326_s10, 128  }
  0x40   : > { %2658 = vsyncadd (%p2838_p12), %s326_s10, 4294967168 }
  0x41   : > { %2660 = dma.done.wait (%p47_p1), [#allocation6], 4096  }
  0x42   : > { %2662 = vsyncadd (%p47_p1), [#allocation6], 4294963200 }
  0x43   : > { %2664 = dma.done.wait (%p47_p1), [#allocation9], 4160  }
  0x44   : > { %2666 = vsyncadd (%p47_p1), [#allocation9], 4294963136 }
  0x45   : > { %2668 = dma.done.wait (%p47_p1), [#allocation12], 4224  }
  0x46   : > { %2670 = vsyncadd (%p47_p1), [#allocation12], 4294963072  ;;  %v1851_v0 = vld [vmem:[#allocation5 + $0xa8] sm:$0xf]  ;;  %v2187_v1 = vld [vmem:[#allocation5 + $0xb0] sm:$0xf0] }
  0x47   : > { %v2186_v2 = vld [vmem:[#allocation5 + $0xac] sm:$0xf]  ;;  %v1852_v3 = vor.u32 %v2187_v1, %v1851_v0  ;;  %v1853_v4 = vld [vmem:[#allocation5 + $0xb4] sm:$0xf0]  ;;  %v1839_v5 = vld [vmem:[#allocation5 + $0x90] sm:$0xf] }
  0x48   : > { %v2184_v6 = vld [vmem:[#allocation5 + $0x98] sm:$0xf0]  ;;  %v1856_v7 = vor.u32 %v2186_v2, %v1853_v4  ;;  %v2183_v8 = vld [vmem:[#allocation5 + $0x94] sm:$0xf]  ;;  %v1841_v9 = vld [vmem:[#allocation5 + $0x9c] sm:$0xf0] }
  0x49   : > { %555 = vmatpush.bf16.msra.mxu0 %v1852_v3  ;;  %v1840_v10 = vor.u32 %v2184_v6, %v1839_v5  ;;  %v1844_v11 = vor.u32 %v2183_v8, %v1841_v9  ;;  %v1827_v12 = vld [vmem:[#allocation5 + $0x78] sm:$0xf]  ;;  %v2181_v13 = vld [vmem:[#allocation5 + $0x80] sm:$0xf0]  ;;  %v2180_v14 = vld [vmem:[#allocation5 + $0x7c] sm:$0xf] }
  0x4a   : > { %568 = vmatpush.bf16.msra.mxu1 %v1856_v7  ;;  %v1829_v15 = vld [vmem:[#allocation5 + $0x84] sm:$0xf0]  ;;  %v1828_v16 = vor.u32 %v2181_v13, %v1827_v12  ;;  %v1815_v18 = vld [vmem:[#allocation5 + $0x60] sm:$0xf]  ;;  %v2178_v19 = vld [vmem:[#allocation5 + $0x68] sm:$0xf0] }
  0x4b   : > { %v1832_v17 = vor.u32 %v2180_v14, %v1829_v15  ;;  %v2177_v20 = vld [vmem:[#allocation5 + $0x64] sm:$0xf]  ;;  %v1817_v21 = vld [vmem:[#allocation5 + $0x6c] sm:$0xf0]  ;;  %v1816_v22 = vor.u32 %v2178_v19, %v1815_v18  ;;  %v2188_v24 = vld [vmem:[#allocation5 + $0xb8] sm:$0xf0] }
  0x4c   : > { %v1859_v23 = vld [vmem:[#allocation5 + $0xb0] sm:$0xf]  ;;  %v1847_v25 = vld [vmem:[#allocation5 + $0x98] sm:$0xf]  ;;  %v1820_v26 = vor.u32 %v2177_v20, %v1817_v21  ;;  %v1803_v27 = vld [vmem:[#allocation5 + $0x48] sm:$0xf] }
  0x4d   : > { %556 = vmatpush.bf16.msra.mxu0 %v1840_v10  ;;  %v2175_v28 = vld [vmem:[#allocation5 + $0x50] sm:$0xf0]  ;;  %v1860_v29 = vor.u32 %v2188_v24, %v1859_v23  ;;  %v2185_v30 = vld [vmem:[#allocation5 + $0xa0] sm:$0xf0]  ;;  %v2174_v31 = vld [vmem:[#allocation5 + $0x4c] sm:$0xf] }
  0x4e   : > { %569 = vmatpush.bf16.msra.mxu1 %v1844_v11  ;;  %v1805_v32 = vld [vmem:[#allocation5 + $0x54] sm:$0xf0]  ;;  %v1848_v33 = vor.u32 %v2185_v30, %v1847_v25  ;;  %v1804_v34 = vor.u32 %v2175_v28, %v1803_v27  ;;  %v1835_v35 = vld [vmem:[#allocation5 + $0x80] sm:$0xf]  ;;  %v2182_v36 = vld [vmem:[#allocation5 + $0x88] sm:$0xf0] }
  0x4f   : > { %581 = vmatpush.bf16.msra.mxu2 %v1860_v29  ;;  %v1808_v37 = vor.u32 %v2174_v31, %v1805_v32  ;;  %v1791_v38 = vld [vmem:[#allocation5 + $0x30] sm:$0xf]  ;;  %v2172_v39 = vld [vmem:[#allocation5 + $0x38] sm:$0xf0]  ;;  %v2171_v40 = vld [vmem:[#allocation5 + $0x34] sm:$0xf]  ;;  %v1836_v42 = vor.u32 %v2182_v36, %v1835_v35  ;;  %v594_v31 = vlaneseq }
  0x50   : > { %v1793_v41 = vld [vmem:[#allocation5 + $0x3c] sm:$0xf0]  ;;  %v1792_v43 = vor.u32 %v2172_v39, %v1791_v38  ;;  %v1823_v44 = vld [vmem:[#allocation5 + $0x68] sm:$0xf]  ;;  %v2179_v45 = vld [vmem:[#allocation5 + $0x70] sm:$0xf0] }
  0x51   : > { %557 = vmatpush.bf16.msra.mxu0 %v1828_v16  ;;  %v1796_v46 = vor.u32 %v2171_v40, %v1793_v41  ;;  %v1779_v47 = vld [vmem:[#allocation5 + $0x18] sm:$0xf]  ;;  %v2169_v48 = vld [vmem:[#allocation5 + $0x20] sm:$0xf0]  ;;  %v2168_v49 = vld [vmem:[#allocation5 + $0x1c] sm:$0xf]  ;;  %v1824_v51 = vor.u32 %v2179_v45, %v1823_v44 }
  0x52   : > { %570 = vmatpush.bf16.msra.mxu1 %v1832_v17  ;;  %v1781_v50 = vld [vmem:[#allocation5 + $0x24] sm:$0xf0]  ;;  %v1780_v52 = vor.u32 %v2169_v48, %v1779_v47  ;;  %v1811_v53 = vld [vmem:[#allocation5 + $0x50] sm:$0xf]  ;;  %v2176_v54 = vld [vmem:[#allocation5 + $0x58] sm:$0xf0] }
  0x53   : > { %582 = vmatpush.bf16.msra.mxu2 %v1848_v33  ;;  %v1784_v55 = vor.u32 %v2168_v49, %v1781_v50  ;;  %v1767_v56 = vld [vmem:[#allocation5] sm:$0xf]  ;;  %v2166_v57 = vld [vmem:[#allocation5 + $0x8] sm:$0xf0]  ;;  %v2165_v58 = vld [vmem:[#allocation5 + $0x4] sm:$0xf]  ;;  %v1812_v60 = vor.u32 %v2176_v54, %v1811_v53 }
  0x54   : > { %v1769_v59 = vld [vmem:[#allocation5 + $0xc] sm:$0xf0]  ;;  %v1768_v61 = vor.u32 %v2166_v57, %v1767_v56  ;;  %v1799_v63 = vld [vmem:[#allocation5 + $0x38] sm:$0xf]  ;;  %v2173_v0 = vld [vmem:[#allocation5 + $0x40] sm:$0xf0] }
  0x55   : > { %558 = vmatpush.bf16.msra.mxu0 %v1816_v22  ;;  %v2901_v62 = vld [vmem:[%s2882_s1] sm:$0xff]  ;;  %v1772_v1 = vor.u32 %v2165_v58, %v1769_v59  ;;  %v1800_v3 = vor.u32 %v2173_v0, %v1799_v63  ;;  %v1787_v4 = vld [vmem:[#allocation5 + $0x20] sm:$0xf]  ;;  %v2170_v5 = vld [vmem:[#allocation5 + $0x28] sm:$0xf0]  ;;  %vm603_vm0 = vcmask 261120  }
  0x56   : > { %571 = vmatpush.bf16.msra.mxu1 %v1820_v26  ;;  %v394_v2 = vpack.c.bf16 %v2901_v62, %v2901_v62  ;;  %v1788_v6 = vor.u32 %v2170_v5, %v1787_v4  ;;  %v1775_v7 = vld [vmem:[#allocation5 + $0x8] sm:$0xf]  ;;  %v2167_v8 = vld [vmem:[#allocation5 + $0x10] sm:$0xf0]  ;;  %s2703_s2 = smov 32   ;;  %s2704_s9 = smov 96  }
  0x57   : > { %583 = vmatpush.bf16.msra.mxu2 %v1836_v42  ;;  %v1776_v9 = vor.u32 %v2167_v8, %v1775_v7  ;;  %v2190_v10 = vld [vmem:[#allocation7 + $0x8] sm:$0xff]  ;;  %s2705_s15 = smov 64   ;;  %v2189_v22 = vld [vmem:[#allocation7] sm:$0xff]  ;;  %vm639_vm1 = vcmask 1043456   ;;  %v595_v32 = vshrl.u32 %v594_v31, 7  ;;  %v597_v33 = vand.u32 127, %v594_v31 }
  0x58   : > { %vm623_vm3 = vcmask 64512   ;;  %v2192_v31 = vld [vmem:[#allocation7 + $0x18] sm:$0xff]  ;;  %s2162_s12 = sshll.u32 %s2772_s8, 3  ;;  %s390_s21 = scalar_lea.vmem [#allocation14], %s1757_s29 }
  0x59   : > { %559 = vmatpush.bf16.msra.mxu0 %v1804_v34  ;;  %vm598_vm2 = vcmp.ge.s32.totalorder %v595_v32, %v597_v33  ;;  %v2706_v34 = vmov -1e+30   ;;  %s1613_s11 = scalar_lea.hbm %s3012_s7, %s2162_s12  ;;  %s1615_s22 = sshll.u32 %s390_s21, 4  ;;  %s1616_s22 = int_to_ptr.vmem [resolvable:$true] %s1615_s22 }
  0x5a   : > { %572 = vmatpush.bf16.msra.mxu1 %v1808_v37  ;;  %v599_v35 = vsel %vm598_vm2, 0.0, %v2706_v34  ;;  %v2191_v34 = vld [vmem:[#allocation7 + $0x10] sm:$0xff]  ;;  %s1617_s23 = sshll.u32 %s1613_s11, 4  ;;  %s1603_s8 = scalar_lea.sflag [#allocation4], %s2876_s18  ;;  %s1618_s23 = int_to_ptr.hbm [resolvable:$true] %s1617_s23 }
  0x5b   : > { %584 = vmatpush.bf16.msra.mxu2 %v1824_v51  ;;  %s2625_s28 = sshra.s32 %s1618_s23, 4  ;;  %s2626_s28 = int_to_ptr.hbm [resolvable:$true] %s2625_s28 }
  0x5c   : > { %s2627_s17 = scalar_lea.hbm %s2626_s28, 8  ;;  %p2632_p12 = scmp.lt.s32.totalorder %s2626_s28, %s3012_s7 }
  0x5d   : > { %560 = vmatpush.bf16.msra.mxu0 %v1792_v43  ;;  %p2628_p1 = scmp.ne.s32.totalorder %s2626_s28, %s2627_s17 }
  0x5e   : > { %573 = vmatpush.bf16.msra.mxu1 %v1796_v46 }
  0x5f   : > { %585 = vmatpush.bf16.msra.mxu2 %v1812_v60  ;;  %p2629_p3 = pnand %p2628_p1, %p2845_p4 }
  0x61   : > { %561 = vmatpush.bf16.msra.mxu0 %v1780_v52  ;;  %p2630_p5 = pneg %p2629_p3 }
  0x62   : > { %574 = vmatpush.bf16.msra.mxu1 %v1784_v55 }
  0x63   : > { %586 = vmatpush.bf16.msra.mxu2 %v1800_v3 }
  0x65   : > { %562 = vmatpush.bf16.msra.mxu0 %v1768_v61 }
  0x66   : > { %575 = vmatpush.bf16.msra.mxu1 %v1772_v1 }
  0x67   : > { %587 = vmatpush.bf16.msra.mxu2 %v1788_v6 }
  0x68   : > { %563 = vmatmul.bf16.vlgmr.msra.gmra.mxu0 %v394_v2 }
  0x69   : > { %576 = vmatmul.bf16.vlgmr.msra.gmra.mxu1 %v394_v2 }
  0x6a   : > { %753 = vmatpush.bf16.msrb.mxu1 %v2192_v31  ;;  %v2223_v31 = vld [vmem:[#allocation8 + $0xcc] sm:$0xf0] }
  0x6b   : > { %588 = vmatpush.bf16.msra.mxu2 %v1776_v9 }
  0x6e   : > { %589 = vmatmul.bf16.vlgmr.msra.gmra.mxu2 %v394_v2  ;;  %754 = vmatpush.bf16.msrb.mxu1 %v2191_v34  ;;  %v2005_v34 = vld [vmem:[#allocation8 + $0xd0] sm:$0xf0] }
  0x6f   : > { %781 = vmatpush.bf16.msrb.mxu2 %v2190_v10 }
  0x73   : > { %782 = vmatpush.bf16.msrb.mxu2 %v2189_v22 }
  0xe5   : > { %v564_v11 = vpop.f32.mrf.mxu0 }
  0xe6   : > { %v577_v12 = vpop.f32.mrf.mxu1  ;;  %v600_v14 = vpack.c.bf16 %v564_v11, %v564_v11 }
  0xe7   : > { %v601_v13 = vpack.c.bf16 %v577_v12, %v577_v12 }
  0xe8   : > { %v662_v18 = vunpack.c.l.b16 %v600_v14 }
  0xe9   : > { %v667_v15 = vunpack.c.l.b16 %v601_v13  ;;  %v608_v16 = vsel %vm603_vm0, %v601_v13, 0 }
  0xea   : > { %617 = vmatpush.bf16.xpose.msra.mxu3 %v608_v16  ;;  %v663_v21 = vpack.c.b16 %v662_v18, %v662_v18 }
  0xeb   : > { %v668_v17 = vpack.c.b16 %v667_v15, %v667_v15 }
  0xed   : > { %881 = vrot.lane.b32.xlu2 %v668_v17, %s2703_s2  ;;  %669 = vrot.lane.b32.xlu1 %v668_v17, %s2704_s9  ;;  %v566_v19 = vpop.f32.mrf.mxu0 }
  0xee   : > { %v579_v20 = vpop.f32.mrf.mxu1 }
  0xf1   : > { %1861 = vmatmul.msk.bf16.vlgmr.msra.gmra.mxu3 %vm603_vm0, %v600_v14  ;;  %v590_v23 = vpop.f32.mrf.mxu2 }
  0xf2   : > { %v602_v25 = vpack.c.bf16 %v590_v23, %v590_v23 }
  0xf4   : > { %v641_v26 = vsel %vm639_vm1, %v602_v25, 0  ;;  %v703_v2 = vunpack.c.l.b16 %v602_v25 }
  0xf5   : > { %790 = vrot.lane.b32.xlu2 %v668_v17, %s2705_s15  ;;  %664 = vrot.lane.b32.xlu1 %v663_v21, %s2704_s9 }
  0xf6   : > { %650 = vmatpush.bf16.msrb.mxu3 %v641_v26  ;;  %v704_v3 = vpack.c.b16 %v703_v2, %v703_v2 }
  0xf9   : > { %v592_v24 = vpop.f32.mrf.mxu2 }
  0xfd   : > { %788 = vrot.lane.b32.xlu1 %v663_v21, %s2705_s15 }
 0x147   : > { %v882_v27 = vpop.permute.xlu2 %881 }
 0x148   : > { %v887_v28 = vsel %vm603_vm0, %v882_v27, 0 }
 0x149   : > { %896 = vmatpush.bf16.xpose.msra.mxu2 %v887_v28 }
 0x14f   : > { %v791_v48 = vpop.permute.xlu2 %790 }
 0x150   : > { %v796_v50 = vsel %vm603_vm0, %v791_v48, 0  ;;  %v2196_v48 = vld [vmem:[#allocation7 + $0x38] sm:$0xff] }
 0x15f   : > { %v670_v29 = vpop.permute.xlu1 %669 }
 0x160   : > { %v675_v30 = vsel %vm603_vm0, %v670_v29, 0 }
 0x161   : > { %684 = vmatpush.bf16.xpose.msra.mxu3 %v675_v30 }
 0x167   : > { %v665_v51 = vpop.permute.xlu1 %664 }
 0x16f   : > { %v789_v52 = vpop.permute.xlu1 %788 }
 0x174   : > { %v619_v36 = vpop.f32.mrf.mxu3 }
 0x175   : > { %v620_v37 = vadd.f32 %v619_v36, %v599_v35 }
 0x177   : > { %v624_v38 = vsel %vm623_vm3, %v620_v37, -inf }
 0x178   : > { %625 = vmax.xlane.f32.xlu0 %v624_v38 }
 0x17c   : > { %v621_v39 = vpop.f32.mrf.mxu3 }
 0x1eb   : > { %v626_v40 = vpop.xlane.xlu0 %625 }
 0x1ec   : > { %v627_v41 = vsub.f32 %v620_v37, %v626_v40 }
 0x1ee   : > { %v628_v42 = vmul.f32 1.442695, %v627_v41 }
 0x1f0   : > { %2379 = vpow2.f32 %v628_v42 }
 0x1f6   : > { %v2380_v43 = vpop.eup %2379 }
 0x1f7   : > { %v630_v44 = vsel %vm623_vm3, %v2380_v43, 0.0 }
 0x1f8   : > { %631 = vadd.xlane.f32.xlu0 %v630_v44 }
 0x20c   : > { %879 = vrot.lane.b32.xlu0 %v663_v21, %s2703_s2 }
 0x26b   : > { %v632_v45 = vpop.xlane.xlu0 %631 }
 0x26c   : > { %2381 = vrcp.f32 %v632_v45 }
 0x272   : > { %v2382_v46 = vpop.eup %2381 }
 0x273   : > { %v634_v47 = vmul.f32 %v2382_v46, %v2380_v43 }
 0x275   : > { %v635_v49 = vpack.c.bf16 %v634_v47, %v634_v47 }
 0x277   : > { %1862 = vmatmul.msk.bf16.vlgmr.msrb.gmra.mxu3 %vm623_vm3, %v635_v49  ;;  %v2195_v49 = vld [vmem:[#allocation7 + $0x30] sm:$0xff] }
 0x278   : > { %805 = vmatpush.bf16.xpose.msrb.mxu3 %v796_v50  ;;  %v2194_v50 = vld [vmem:[#allocation7 + $0x28] sm:$0xff] }
 0x279   : > { %871 = vmatpush.bf16.msra.mxu1 %v2194_v50 }
 0x27e   : > { %v880_v58 = vpop.permute.xlu0 %879 }
 0x287   : > { %1863 = vmatmul.msk.bf16.vlgmr.msra.gmra.mxu3 %vm603_vm0, %v665_v51  ;;  %v2193_v51 = vld [vmem:[#allocation7 + $0x20] sm:$0xff] }
 0x288   : > { %872 = vmatpush.bf16.msra.mxu1 %v2193_v51  ;;  %v2218_v51 = vld [vmem:[#allocation8 + $0xac] sm:$0xf] }
 0x297   : > { %1883 = vmatmul.msk.bf16.vlgmr.msrb.gmra.mxu3 %vm603_vm0, %v789_v52 }
 0x2fa   : > { %v652_v53 = vpop.f32.mrf.mxu3 }
 0x2fb   : > { %v656_v54 = vpack.c.bf16 %v652_v53, %v652_v53 }
 0x2fd   : > { %1882 = vmatmul.msk.bf16.vlgmr.msrb.gmra.mxu2 %vm603_vm0, %v656_v54 }
 0x302   : > { %v654_v55 = vpop.f32.mrf.mxu3 }
 0x30a   : > { %v686_v56 = vpop.f32.mrf.mxu3 }
 0x30b   : > { %v687_v57 = vadd.f32 %v686_v56, %v599_v35 }
 0x30d   : > { %1894 = vmatmul.msk.bf16.vlgmr.msra.gmra.mxu2 %vm603_vm0, %v880_v58  ;;  %v690_v59 = vsel %vm623_vm3, %v687_v57, -inf }
 0x30e   : > { %691 = vmax.xlane.f32.xlu2 %v690_v59 }
 0x312   : > { %v688_v60 = vpop.f32.mrf.mxu3 }
 0x31a   : > { %v807_v61 = vpop.f32.mrf.mxu3 }
 0x31b   : > { %v808_v63 = vadd.f32 %v807_v61, %v599_v35 }
 0x31d   : > { %v811_v0 = vsel %vm623_vm3, %v808_v63, -inf }
 0x31e   : > { %812 = vmax.xlane.f32.xlu0 %v811_v0 }
 0x322   : > { %v809_v1 = vpop.f32.mrf.mxu3 }
 0x332   : > { %914 = vrot.lane.b32.xlu0 %v704_v3, %s2703_s2  ;;  %s2631_s2 = scalar_lea.hbm %s3012_s7, 16 }
 0x333   : > { %p2633_p7 = scmp.lt.s32.totalorder %s2631_s2, %s2627_s17 }
 0x335   : > { %p2634_p8 = por %p2633_p7, %p2632_p12 }
 0x337   : > { %p2635_p9 = pnand %p2634_p8, %p2630_p5 }
 0x380   : > { %v2927_v4 = vpop.f32.mrf.mxu2 }
 0x381   : > { %v692_v5 = vpop.xlane.xlu2 %691 }
 0x382   : > { %v693_v6 = vsub.f32 %v687_v57, %v692_v5 }
 0x384   : > { %v694_v7 = vmul.f32 1.442695, %v693_v6 }
 0x386   : > { %2383 = vpow2.f32 %v694_v7 }
 0x388   : > { %v786_v8 = vpop.f32.mrf.mxu2 }
 0x38c   : > { %v2384_v9 = vpop.eup %2383 }
 0x38d   : > { %v696_v10 = vsel %vm623_vm3, %v2384_v9, 0.0 }
 0x38e   : > { %697 = vadd.xlane.f32.xlu2 %v696_v10  ;;  %v2019_v10 = vld [vmem:[#allocation8 + $0xe0] sm:$0xf] }
 0x390   : > { %v898_v11 = vpop.f32.mrf.mxu2 }
 0x391   : > { %v899_v12 = vadd.f32 %v898_v11, %v599_v35  ;;  %v813_v13 = vpop.xlane.xlu0 %812  ;;  %v2227_v11 = vld [vmem:[#allocation8 + $0xec] sm:$0xf0] }
 0x392   : > { %v814_v14 = vsub.f32 %v808_v63, %v813_v13  ;;  %v2944_v63 = vld [vmem:[#allocation13] sm:$0xff]  ;;  %v2020_v13 = vor.u32 %v2227_v11, %v2019_v10  ;;  %v2212_v11 = vld [vmem:[#allocation8 + $0x74] sm:$0xf0] }
 0x393   : > { %v902_v15 = vsel %vm623_vm3, %v899_v12, -inf  ;;  %v1963_v10 = vld [vmem:[#allocation8 + $0x68] sm:$0xf] }
 0x394   : > { %v815_v16 = vmul.f32 1.442695, %v814_v14  ;;  %903 = vmax.xlane.f32.xlu1 %v902_v15  ;;  %v2021_v14 = vld [vmem:[#allocation8 + $0xf0] sm:$0xf0]  ;;  %v2027_v15 = vld [vmem:[#allocation8 + $0xe8] sm:$0xf] }
 0x396   : > { %2385 = vpow2.f32 %v815_v16  ;;  %v2228_v16 = vld [vmem:[#allocation8 + $0xf4] sm:$0xf0] }
 0x398   : > { %v900_v17 = vpop.f32.mrf.mxu2 }
 0x399   : > { %v2028_v17 = vor.u32 %v2228_v16, %v2027_v15  ;;  %v1965_v15 = vld [vmem:[#allocation8 + $0x78] sm:$0xf0] }
 0x39c   : > { %v2386_v18 = vpop.eup %2385 }
 0x39d   : > { %v817_v19 = vsel %vm623_vm3, %v2386_v18, 0.0 }
 0x39e   : > { %818 = vadd.xlane.f32.xlu1 %v817_v19  ;;  %v2029_v19 = vld [vmem:[#allocation8 + $0xf8] sm:$0xf0] }
 0x3a4   : > { %v915_v20 = vpop.permute.xlu0 %914 }
 0x3a5   : > { %v920_v21 = vsel %vm639_vm1, %v915_v20, 0 }
 0x3a6   : > { %705 = vrot.lane.b32.xlu2 %v704_v3, %s2704_s9  ;;  %929 = vmatpush.bf16.msra.mxu3 %v920_v21 }
 0x3aa   : > { %1233 = vmatpush.bf16.msrb.mxu3 %v2028_v17  ;;  %v2207_v17 = vld [vmem:[#allocation8 + $0x4c] sm:$0xf0] }
 0x401   : > { %v698_v22 = vpop.xlane.xlu2 %697 }
 0x402   : > { %2387 = vrcp.f32 %v698_v22 }
 0x407   : > { %v904_v23 = vpop.xlane.xlu1 %903 }
 0x408   : > { %v2388_v24 = vpop.eup %2387  ;;  %v905_v25 = vsub.f32 %v899_v12, %v904_v23  ;;  %v2225_v12 = vld [vmem:[#allocation8 + $0xe4] sm:$0xf] }
 0x409   : > { %v700_v26 = vmul.f32 %v2388_v24, %v2384_v9  ;;  %v706_v27 = vpop.permute.xlu2 %705  ;;  %v2707_v9 = vmov 128.0  }
 0x40a   : > { %v906_v28 = vmul.f32 1.442695, %v905_v25  ;;  %v711_v29 = vsel %vm639_vm1, %v706_v27, 0 }
 0x40b   : > { %720 = vmatpush.bf16.msrb.mxu0 %v711_v29  ;;  %v701_v30 = vpack.c.bf16 %v700_v26, %v700_v26 }
 0x40c   : > { %2389 = vpow2.f32 %v906_v28 }
 0x40e   : > { %1864 = vmatmul.msk.bf16.vlgmr.msrb.gmra.mxu0 %vm623_vm3, %v701_v30  ;;  %v2003_v30 = vld [vmem:[#allocation8 + $0xc0] sm:$0xf] }
 0x411   : > { %v819_v35 = vpop.xlane.xlu1 %818 }
 0x412   : > { %v2390_v32 = vpop.eup %2389 }
 0x413   : > { %v908_v33 = vsel %vm623_vm3, %v2390_v32, 0.0 }
 0x414   : > { %909 = vadd.xlane.f32.xlu1 %v908_v33  ;;  %v2004_v33 = vor.u32 %v2223_v31, %v2003_v30  ;;  %v2203_v30 = vld [vmem:[#allocation8 + $0x2c] sm:$0xf0]  ;;  %v2201_v31 = vld [vmem:[#allocation8 + $0x24] sm:$0xf] }
 0x42d   : > { %823 = vrot.lane.b32.xlu1 %v704_v3, %s2705_s15  ;;  %v970_v3 = vperm.slane %v2944_v63, 0 }
 0x487   : > { %v910_v36 = vpop.xlane.xlu1 %909 }
 0x488   : > { %2391 = vrcp.f32 %v910_v36  ;;  %v2224_v36 = vld [vmem:[#allocation8 + $0xd4] sm:$0xf0] }
 0x489   : > { %2393 = vrcp.f32 %v819_v35  ;;  %v2011_v35 = vld [vmem:[#allocation8 + $0xc8] sm:$0xf] }
 0x48a   : > { %2395 = vrcp.f32 %v2707_v9  ;;  %v1957_v9 = vld [vmem:[#allocation8 + $0x70] sm:$0xf0] }
 0x48b   : > { %v722_v37 = vpop.f32.mrf.mxu0 }
 0x48c   : > { %v726_v38 = vpack.c.bf16 %v722_v37, %v722_v37 }
 0x48e   : > { %v2392_v39 = vpop.eup %2391  ;;  %1873 = vmatmul.msk.bf16.vlgmr.msrb.gmra.mxu1 %vm603_vm0, %v726_v38  ;;  %v2012_v38 = vor.u32 %v2224_v36, %v2011_v35  ;;  %v2204_v35 = vld [vmem:[#allocation8 + $0x34] sm:$0xf0] }
 0x48f   : > { %v912_v40 = vmul.f32 %v2392_v39, %v2390_v32  ;;  %v2394_v43 = vpop.eup %2393  ;;  %1207 = vmatpush.bf16.msrb.mxu1 %v2020_v13  ;;  %v2221_v32 = vld [vmem:[#allocation8 + $0xc4] sm:$0xf]  ;;  %v2222_v39 = vld [vmem:[#allocation8 + $0xcc] sm:$0xf]  ;;  %v1964_v13 = vor.u32 %v2212_v11, %v1963_v10 }
 0x490   : > { %v821_v44 = vmul.f32 %v2394_v43, %v2386_v18  ;;  %v2226_v18 = vld [vmem:[#allocation8 + $0xec] sm:$0xf]  ;;  %v2396_v21 = vpop.eup %2395  ;;  %v2008_v37 = vor.u32 %v2221_v32, %v2005_v34  ;;  %1234 = vmatpush.bf16.msrb.mxu3 %v2012_v38  ;;  %v2219_v43 = vld [vmem:[#allocation8 + $0xac] sm:$0xf0]  ;;  %v1931_v34 = vld [vmem:[#allocation8 + $0x28] sm:$0xf] }
 0x491   : > { %v913_v41 = vpack.c.bf16 %v912_v40, %v912_v40  ;;  %v2032_v20 = vor.u32 %v2226_v18, %v2029_v19  ;;  %vm980_vm4 = vweird.f32 %v2396_v21  ;;  %v2013_v40 = vld [vmem:[#allocation8 + $0xd8] sm:$0xf0]  ;;  %v2205_v18 = vld [vmem:[#allocation8 + $0x44] sm:$0xf]  ;;  %v2202_v38 = vld [vmem:[#allocation8 + $0x2c] sm:$0xf] }
 0x492   : > { %v822_v47 = vpack.c.bf16 %v821_v44, %v821_v44  ;;  %v2217_v44 = vld [vmem:[#allocation8 + $0xa4] sm:$0xf] }
 0x493   : > { %v724_v42 = vpop.f32.mrf.mxu0  ;;  %1895 = vmatmul.msk.bf16.vlgmr.msra.gmra.mxu3 %vm623_vm3, %v913_v41  ;;  %1208 = vmatpush.bf16.msrb.mxu1 %v2004_v33  ;;  %v2016_v41 = vor.u32 %v2222_v39, %v2013_v40  ;;  %v1925_v33 = vld [vmem:[#allocation8 + $0x30] sm:$0xf0]  ;;  %v1933_v39 = vld [vmem:[#allocation8 + $0x38] sm:$0xf0]  ;;  %v1907_v40 = vld [vmem:[#allocation8] sm:$0xf] }
 0x494   : > { %v1987_v42 = vld [vmem:[#allocation8 + $0xa0] sm:$0xf]  ;;  %v1928_v36 = vor.u32 %v2201_v31, %v1925_v33  ;;  %v2241_v10 = vld [vmem:[#allocation11 + $0x60] sm:$0xff]  ;;  %v2254_v31 = vld [vmem:[#allocation11 + $0xc8] sm:$0xff] }
 0x495   : > { %v2249_v11 = vld [vmem:[#allocation11 + $0xa0] sm:$0xff]  ;;  %v2247_v33 = vld [vmem:[#allocation11 + $0x90] sm:$0xff] }
 0x49f   : > { %v824_v45 = vpop.permute.xlu1 %823 }
 0x4a0   : > { %v829_v46 = vsel %vm639_vm1, %v824_v45, 0  ;;  %v1988_v45 = vor.u32 %v2219_v43, %v1987_v42  ;;  %v2199_v42 = vld [vmem:[#allocation8 + $0xc] sm:$0xf0]  ;;  %v2197_v43 = vld [vmem:[#allocation8 + $0x4] sm:$0xf] }
 0x4a1   : > { %838 = vmatpush.bf16.msra.mxu0 %v829_v46  ;;  %v1989_v46 = vld [vmem:[#allocation8 + $0xb0] sm:$0xf0] }
 0x4a2   : > { %1209 = vmatpush.bf16.msrb.mxu1 %v1988_v45  ;;  %v1908_v45 = vor.u32 %v2199_v42, %v1907_v40 }
 0x4a4   : > { %1884 = vmatmul.msk.bf16.vlgmr.msra.gmra.mxu0 %vm623_vm3, %v822_v47  ;;  %v1995_v47 = vld [vmem:[#allocation8 + $0xa8] sm:$0xf] }
 0x4a5   : > { %962 = vmatpush.bf16.msrb.mxu0 %v2196_v48  ;;  %v2220_v48 = vld [vmem:[#allocation8 + $0xb4] sm:$0xf0] }
 0x4a6   : > { %v1996_v50 = vor.u32 %v2220_v48, %v1995_v47  ;;  %v1915_v47 = vld [vmem:[#allocation8 + $0x8] sm:$0xf]  ;;  %v2200_v48 = vld [vmem:[#allocation8 + $0x14] sm:$0xf0] }
 0x4a8   : > { %1235 = vmatpush.bf16.msrb.mxu3 %v1996_v50  ;;  %v1916_v50 = vor.u32 %v2200_v48, %v1915_v47 }
 0x4a9   : > { %963 = vmatpush.bf16.msrb.mxu0 %v2195_v49  ;;  %v1992_v49 = vor.u32 %v2217_v44, %v1989_v46  ;;  %v1909_v44 = vld [vmem:[#allocation8 + $0x10] sm:$0xf0] }
 0x4aa   : > { %v1912_v46 = vor.u32 %v2197_v43, %v1909_v44 }
 0x4ad   : > { %1246 = vmatpush.bf16.msra.mxu0 %v2032_v20  ;;  %v1941_v20 = vld [vmem:[#allocation8 + $0x50] sm:$0xf0] }
 0x4b1   : > { %1247 = vmatpush.bf16.msra.mxu0 %v2016_v41  ;;  %v1936_v41 = vor.u32 %v2202_v38, %v1933_v39  ;;  %v2245_v38 = vld [vmem:[#allocation11 + $0x80] sm:$0xff]  ;;  %v1037_v39 = vld [vmem:[#allocation10] sm:$0xf] }
 0x4b2   : > { %v1039_v40 = vperm.slane %v1037_v39, 0  ;;  %v1040_v47 = vperm.slane %v1037_v39, 1 }
 0x50b   : > { %v756_v52 = vpop.f32.mrf.mxu1 }
 0x50c   : > { %v785_v0 = vadd.f32 %v2927_v4, %v756_v52  ;;  %v2024_v4 = vor.u32 %v2225_v12, %v2021_v14  ;;  %v1997_v52 = vld [vmem:[#allocation8 + $0xb8] sm:$0xf0]  ;;  %v2210_v14 = vld [vmem:[#allocation8 + $0x6c] sm:$0xf] }
 0x50d   : > { %v1968_v16 = vor.u32 %v2210_v14, %v1965_v15  ;;  %v2232_v14 = vld [vmem:[#allocation11 + $0x18] sm:$0xff] }
 0x50e   : > { %1220 = vmatpush.bf16.msrb.mxu2 %v2024_v4  ;;  %v1939_v4 = vld [vmem:[#allocation8 + $0x40] sm:$0xf] }
 0x50f   : > { %v1940_v19 = vor.u32 %v2207_v17, %v1939_v4  ;;  %v2256_v15 = vld [vmem:[#allocation11 + $0xd8] sm:$0xff] }
 0x510   : > { %v2248_v4 = vld [vmem:[#allocation11 + $0x98] sm:$0xff] }
 0x512   : > { %1221 = vmatpush.bf16.msrb.mxu2 %v2008_v37  ;;  %v1932_v37 = vor.u32 %v2204_v35, %v1931_v34  ;;  %v2253_v34 = vld [vmem:[#allocation11 + $0xc0] sm:$0xff]  ;;  %v2238_v35 = vld [vmem:[#allocation11 + $0x48] sm:$0xff] }
 0x513   : > { %v758_v53 = vpop.f32.mrf.mxu1 }
 0x514   : > { %v2000_v53 = vor.u32 %v2218_v51, %v1997_v52  ;;  %v1917_v51 = vld [vmem:[#allocation8 + $0x18] sm:$0xf0] }
 0x516   : > { %v931_v54 = vpop.f32.mrf.mxu3  ;;  %1222 = vmatpush.bf16.msrb.mxu2 %v1992_v49  ;;  %1248 = vmatpush.bf16.msra.mxu0 %v2000_v53  ;;  %v2198_v49 = vld [vmem:[#allocation8 + $0xc] sm:$0xf] }
 0x517   : > { %v935_v55 = vpack.c.bf16 %v931_v54, %v931_v54  ;;  %v1971_v54 = vld [vmem:[#allocation8 + $0x80] sm:$0xf]  ;;  %v1920_v52 = vor.u32 %v2198_v49, %v1917_v51  ;;  %v1041_v49 = vperm.slane %v1037_v39, 2 }
 0x519   : > { %1904 = vmatmul.msk.bf16.vlgmr.msrb.gmra.mxu0 %vm603_vm0, %v935_v55  ;;  %v2215_v55 = vld [vmem:[#allocation8 + $0x8c] sm:$0xf0] }
 0x51e   : > { %v933_v56 = vpop.f32.mrf.mxu3 }
 0x51f   : > { %v2213_v56 = vld [vmem:[#allocation8 + $0x84] sm:$0xf] }
 0x521   : > { %v840_v57 = vpop.f32.mrf.mxu0 }
 0x522   : > { %v844_v58 = vpack.c.bf16 %v840_v57, %v840_v57  ;;  %v1972_v57 = vor.u32 %v2215_v55, %v1971_v54  ;;  %v2236_v54 = vld [vmem:[#allocation11 + $0x38] sm:$0xff] }
 0x523   : > { %v2260_v55 = vld [vmem:[#allocation11 + $0xf8] sm:$0xff] }
 0x524   : > { %1893 = vmatmul.msk.bf16.vlgmr.msra.gmra.mxu1 %vm603_vm0, %v844_v58  ;;  %v1973_v58 = vld [vmem:[#allocation8 + $0x90] sm:$0xf0] }
 0x525   : > { %1210 = vmatpush.bf16.msrb.mxu1 %v1972_v57  ;;  %v2244_v57 = vld [vmem:[#allocation11 + $0x78] sm:$0xff] }
 0x529   : > { %v842_v59 = vpop.f32.mrf.mxu0 }
 0x52a   : > { %v1979_v59 = vld [vmem:[#allocation8 + $0x88] sm:$0xf] }
 0x596   : > { %v965_v60 = vpop.f32.mrf.mxu0 }
 0x59e   : > { %v967_v61 = vpop.f32.mrf.mxu0 }
 0x59f   : > { %v1976_v61 = vor.u32 %v2213_v56, %v1973_v58  ;;  %v2252_v58 = vld [vmem:[#allocation11 + $0xb8] sm:$0xff] }
 0x5a1   : > { %v874_v1 = vpop.f32.mrf.mxu1  ;;  %1223 = vmatpush.bf16.msrb.mxu2 %v1976_v61 }
 0x5a2   : > { %v878_v2 = vadd.f32 %v874_v1, %v785_v0  ;;  %v2214_v1 = vld [vmem:[#allocation8 + $0x8c] sm:$0xf] }
 0x5a4   : > { %v969_v5 = vadd.f32 %v965_v60, %v878_v2  ;;  %v2216_v60 = vld [vmem:[#allocation8 + $0x94] sm:$0xf0]  ;;  %v1981_v2 = vld [vmem:[#allocation8 + $0x98] sm:$0xf0] }
 0x5a5   : > { %v1980_v0 = vor.u32 %v2216_v60, %v1979_v59  ;;  %v2235_v59 = vld [vmem:[#allocation11 + $0x30] sm:$0xff] }
 0x5a6   : > { %v971_v6 = vadd.f32 %v970_v3, %v969_v5  ;;  %v1984_v3 = vor.u32 %v2214_v1, %v1981_v2  ;;  %v1955_v5 = vld [vmem:[#allocation8 + $0x60] sm:$0xf]  ;;  %v2259_v60 = vld [vmem:[#allocation11 + $0xf0] sm:$0xff]  ;;  %v2234_v2 = vld [vmem:[#allocation11 + $0x28] sm:$0xff] }
 0x5a7   : > { %1236 = vmatpush.bf16.msrb.mxu3 %v1980_v0  ;;  %v2243_v0 = vld [vmem:[#allocation11 + $0x70] sm:$0xff] }
 0x5a8   : > { %v972_v7 = vadd.f32 %v971_v6, %v2901_v62  ;;  %v976_v62 = vmul.f32 128.0, %v2396_v21  ;;  %v2211_v6 = vld [vmem:[#allocation8 + $0x6c] sm:$0xf0]  ;;  %1249 = vmatpush.bf16.msra.mxu0 %v1984_v3  ;;  %v2251_v1 = vld [vmem:[#allocation11 + $0xb0] sm:$0xff] }
 0x5a9   : > { %v876_v8 = vpop.f32.mrf.mxu1  ;;  %v2258_v3 = vld [vmem:[#allocation11 + $0xe8] sm:$0xff] }
 0x5aa   : > { %973 = vadd.xlane.f32.xlu2 %v972_v7  ;;  %v977_v22 = vsub.f32 1.0, %v976_v62  ;;  %v1956_v8 = vor.u32 %v2211_v6, %v1955_v5  ;;  %v2208_v62 = vld [vmem:[#allocation8 + $0x54] sm:$0xf0]  ;;  %v2242_v5 = vld [vmem:[#allocation11 + $0x68] sm:$0xff] }
 0x5ab   : > { %1237 = vmatpush.bf16.msrb.mxu3 %v1964_v13  ;;  %v2250_v6 = vld [vmem:[#allocation11 + $0xa8] sm:$0xff] }
 0x5ac   : > { %v978_v23 = vmul.f32 %v2396_v21, %v977_v22  ;;  %1211 = vmatpush.bf16.msrb.mxu1 %v1956_v8  ;;  %1250 = vmatpush.bf16.msra.mxu0 %v1968_v16  ;;  %v1944_v22 = vor.u32 %v2205_v18, %v1941_v20  ;;  %v2257_v8 = vld [vmem:[#allocation11 + $0xe0] sm:$0xff]  ;;  %v2240_v16 = vld [vmem:[#allocation11 + $0x58] sm:$0xff]  ;;  %v2255_v20 = vld [vmem:[#allocation11 + $0xd0] sm:$0xff] }
 0x5ae   : > { %v979_v24 = vadd.f32 %v2396_v21, %v978_v23 }
 0x5b0   : > { %v2949_v25 = vsel %vm980_vm4, %v2396_v21, %v979_v24  ;;  %v1947_v21 = vld [vmem:[#allocation8 + $0x48] sm:$0xf]  ;;  %v2206_v24 = vld [vmem:[#allocation8 + $0x4c] sm:$0xf]  ;;  %1212 = vmatpush.bf16.msrb.mxu1 %v1940_v19  ;;  %v2231_v19 = vld [vmem:[#allocation11 + $0x10] sm:$0xff] }
 0x5b1   : > { %v1948_v23 = vor.u32 %v2208_v62, %v1947_v21  ;;  %v1000_v62 = vperm.slane %v2944_v63, 1 }
 0x5b3   : > { %1238 = vmatpush.bf16.msrb.mxu3 %v1948_v23 }
 0x5b7   : > { %1239 = vmatpush.bf16.msrb.mxu3 %v1932_v37  ;;  %v2237_v37 = vld [vmem:[#allocation11 + $0x40] sm:$0xff] }
 0x5bb   : > { %1240 = vmatpush.bf16.msrb.mxu3 %v1916_v50 }
 0x5bf   : > { %1550 = vmatpush.bf16.msra.mxu3 %v2252_v58 }
 0x5c3   : > { %1551 = vmatpush.bf16.msra.mxu3 %v2251_v1 }
 0x5c7   : > { %1552 = vmatpush.bf16.msra.mxu3 %v2250_v6 }
 0x5cb   : > { %1553 = vmatpush.bf16.msra.mxu3 %v2249_v11 }
 0x5cf   : > { %1554 = vmatpush.bf16.msra.mxu3 %v2248_v4 }
 0x5d3   : > { %1555 = vmatpush.bf16.msra.mxu3 %v2247_v33 }
 0x61d   : > { %v974_v26 = vpop.xlane.xlu2 %973 }
 0x61e   : > { %v982_v27 = vmul.f32 %v2949_v25, %v974_v26  ;;  %v1949_v26 = vld [vmem:[#allocation8 + $0x58] sm:$0xf0] }
 0x620   : > { %v2952_v28 = vsub.f32 %v972_v7, %v982_v27  ;;  %v2209_v7 = vld [vmem:[#allocation8 + $0x64] sm:$0xf]  ;;  %v1952_v27 = vor.u32 %v2206_v24, %v1949_v26  ;;  %v1002_v24 = vperm.slane %v2944_v63, 2 }
 0x621   : > { %v1960_v12 = vor.u32 %v2209_v7, %v1957_v9  ;;  %v2233_v7 = vld [vmem:[#allocation11 + $0x20] sm:$0xff] }
 0x622   : > { %v984_v29 = vmul.f32 %v2952_v28, %v2952_v28  ;;  %1251 = vmatpush.bf16.msra.mxu0 %v1952_v27 }
 0x623   : > { %1224 = vmatpush.bf16.msrb.mxu2 %v1960_v12 }
 0x624   : > { %985 = vadd.xlane.f32.xlu0 %v984_v29  ;;  %v1923_v29 = vld [vmem:[#allocation8 + $0x20] sm:$0xf] }
 0x625   : > { %v1924_v32 = vor.u32 %v2203_v30, %v1923_v29  ;;  %v2230_v30 = vld [vmem:[#allocation11 + $0x8] sm:$0xff] }
 0x626   : > { %1252 = vmatpush.bf16.msra.mxu0 %v1936_v41  ;;  %v1042_v41 = vperm.slane %v1037_v39, 3 }
 0x627   : > { %1225 = vmatpush.bf16.msrb.mxu2 %v1944_v22  ;;  %1213 = vmatpush.bf16.msrb.mxu1 %v1924_v32  ;;  %v2239_v32 = vld [vmem:[#allocation11 + $0x50] sm:$0xff] }
 0x62a   : > { %1253 = vmatpush.bf16.msra.mxu0 %v1920_v52 }
 0x62b   : > { %1226 = vmatpush.bf16.msrb.mxu2 %v1928_v36  ;;  %1214 = vmatpush.bf16.msrb.mxu1 %v1908_v45  ;;  %v2246_v36 = vld [vmem:[#allocation11 + $0x88] sm:$0xff] }
 0x62c   : > { %1556 = vmatpush.bf16.msra.mxu3 %v2246_v36 }
 0x62e   : > { %1563 = vmatpush.bf16.msrb.mxu0 %v2260_v55 }
 0x62f   : > { %1227 = vmatpush.bf16.msrb.mxu2 %v1912_v46  ;;  %1524 = vmatpush.bf16.msra.mxu1 %v2236_v54 }
 0x630   : > { %1557 = vmatpush.bf16.msra.mxu3 %v2245_v38 }
 0x632   : > { %1564 = vmatpush.bf16.msrb.mxu0 %v2259_v60 }
 0x633   : > { %1537 = vmatpush.bf16.msra.mxu2 %v2244_v57  ;;  %1525 = vmatpush.bf16.msra.mxu1 %v2235_v59 }
 0x636   : > { %1565 = vmatpush.bf16.msrb.mxu0 %v2258_v3 }
 0x637   : > { %1538 = vmatpush.bf16.msra.mxu2 %v2243_v0  ;;  %1526 = vmatpush.bf16.msra.mxu1 %v2234_v2 }
 0x63a   : > { %1566 = vmatpush.bf16.msrb.mxu0 %v2257_v8 }
 0x63b   : > { %1539 = vmatpush.bf16.msra.mxu2 %v2242_v5  ;;  %1527 = vmatpush.bf16.msra.mxu1 %v2233_v7  ;;  %v1331_v5 = vperm.slane %v2944_v63, 3 }
 0x63e   : > { %1567 = vmatpush.bf16.msrb.mxu0 %v2256_v15 }
 0x63f   : > { %1540 = vmatpush.bf16.msra.mxu2 %v2241_v10  ;;  %1528 = vmatpush.bf16.msra.mxu1 %v2232_v14 }
 0x642   : > { %1568 = vmatpush.bf16.msrb.mxu0 %v2255_v20 }
 0x643   : > { %1541 = vmatpush.bf16.msra.mxu2 %v2240_v16  ;;  %1529 = vmatpush.bf16.msra.mxu1 %v2231_v19 }
 0x646   : > { %1569 = vmatpush.bf16.msrb.mxu0 %v2254_v31 }
 0x647   : > { %1530 = vmatpush.bf16.msra.mxu1 %v2230_v30  ;;  %1542 = vmatpush.bf16.msra.mxu2 %v2239_v32  ;;  %v1597_v30 = vperm.slane %v2944_v63, 4  ;;  %v1599_v32 = vperm.slane %v2944_v63, 5 }
 0x64a   : > { %1570 = vmatpush.bf16.msrb.mxu0 %v2253_v34 }
 0x64b   : > { %1543 = vmatpush.bf16.msra.mxu2 %v2238_v35 }
 0x64f   : > { %1544 = vmatpush.bf16.msra.mxu2 %v2237_v37 }
 0x697   : > { %v986_v53 = vpop.xlane.xlu0 %985 }
 0x698   : > { %v987_v56 = vmul.f32 %v986_v53, %v2949_v25 }
 0x69a   : > { %v988_v61 = vadd.f32 1e-05, %v987_v56 }
 0x69c   : > { %2397 = vrsqrt.f32 %v988_v61  ;;  %vm995_vm6 = vweird.f32 %v988_v61 }
 0x6a2   : > { %v2398_v9 = vpop.eup %2397 }
 0x6a3   : > { %v990_v12 = vmul.f32 %v2398_v9, %v988_v61  ;;  %vm996_vm5 = vweird.f32 %v2398_v9 }
 0x6a4   : > { %vm997_vm7 = vmor %vm995_vm6, %vm996_vm5 }
 0x6a5   : > { %v991_v13 = vmul.f32 %v2398_v9, %v990_v12 }
 0x6a7   : > { %v992_v17 = vmul.f32 0.5, %v991_v13 }
 0x6a9   : > { %v993_v18 = vsub.f32 1.5, %v992_v17 }
 0x6ab   : > { %v994_v21 = vmul.f32 %v2398_v9, %v993_v18 }
 0x6ad   : > { %v998_v22 = vsel %vm997_vm7, %v2398_v9, %v994_v21 }
 0x6ae   : > { %v999_v23 = vmul.f32 %v998_v22, %v2952_v28  ;;  %v2229_v28 = vld [vmem:[#allocation11] sm:$0xff] }
 0x6af   : > { %1531 = vmatpush.bf16.msra.mxu1 %v2229_v28 }
 0x6b0   : > { %v1001_v26 = vmul.f32 %v1000_v62, %v999_v23 }
 0x6b2   : > { %v2960_v27 = vadd.f32 %v1002_v24, %v1001_v26 }
 0x6b4   : > { %v1004_v29 = vpack.c.bf16 %v2960_v27, %v2960_v27 }
 0x6b6   : > { %1215 = vmatmul.bf16.vlgmr.msrb.gmra.mxu1 %v1004_v29  ;;  %1228 = vmatmul.bf16.vlgmr.msrb.gmra.mxu2 %v1004_v29 }
 0x6b7   : > { %1241 = vmatmul.bf16.vlgmr.msrb.gmra.mxu3 %v1004_v29  ;;  %1254 = vmatmul.bf16.vlgmr.msra.gmra.mxu0 %v1004_v29 }
 0x733   : > { %v1216_v42 = vpop.f32.mrf.mxu1 }
 0x734   : > { %v1217_v43 = vadd.f32 %v1216_v42, %v1039_v40  ;;  %v1255_v44 = vpop.f32.mrf.mxu0 }
 0x735   : > { %v1256_v45 = vadd.f32 %v1255_v44, %v1042_v41 }
 0x736   : > { %v1259_v46 = vmax.f32 %v1217_v43, 0.0 }
 0x737   : > { %v1262_v48 = vmax.f32 %v1256_v45, 0.0 }
 0x738   : > { %v1263_v50 = vpack.c.bf16 %v1259_v46, %v1259_v46 }
 0x739   : > { %v1266_v51 = vpack.c.bf16 %v1262_v48, %v1262_v48  ;;  %v1229_v52 = vpop.f32.mrf.mxu2 }
 0x73a   : > { %v1230_v53 = vadd.f32 %v1229_v52, %v1040_v47  ;;  %v1242_v54 = vpop.f32.mrf.mxu3  ;;  %1532 = vmatmul.bf16.vlgmr.msra.gmra.mxu1 %v1263_v50 }
 0x73b   : > { %v1243_v55 = vadd.f32 %v1242_v54, %v1041_v49  ;;  %1571 = vmatmul.bf16.vlgmr.msrb.gmra.mxu0 %v1266_v51  ;;  %v1218_v56 = vpop.f32.mrf.mxu1 }
 0x73c   : > { %v1260_v57 = vmax.f32 %v1230_v53, 0.0  ;;  %v1257_v58 = vpop.f32.mrf.mxu0 }
 0x73d   : > { %v1261_v59 = vmax.f32 %v1243_v55, 0.0 }
 0x73e   : > { %v1264_v60 = vpack.c.bf16 %v1260_v57, %v1260_v57 }
 0x73f   : > { %v1265_v61 = vpack.c.bf16 %v1261_v59, %v1261_v59 }
 0x740   : > { %1545 = vmatmul.bf16.vlgmr.msra.gmra.mxu2 %v1264_v60 }
 0x741   : > { %1558 = vmatmul.bf16.vlgmr.msra.gmra.mxu3 %v1265_v61  ;;  %v1231_v0 = vpop.f32.mrf.mxu2 }
 0x742   : > { %v1244_v1 = vpop.f32.mrf.mxu3 }
 0x7b7   : > { %v1533_v2 = vpop.f32.mrf.mxu1 }
 0x7b8   : > { %v1572_v3 = vpop.f32.mrf.mxu0  ;;  %v1534_v8 = vadd.f32 %v1533_v2, %v1331_v5 }
 0x7bf   : > { %v1535_v6 = vpop.f32.mrf.mxu1 }
 0x7c0   : > { %v1574_v7 = vpop.f32.mrf.mxu0 }
 0x7c3   : > { %v1546_v9 = vpop.f32.mrf.mxu2 }
 0x7c4   : > { %v1547_v10 = vadd.f32 %v1546_v9, %v1534_v8  ;;  %v1559_v11 = vpop.f32.mrf.mxu3 }
 0x7c6   : > { %v1560_v12 = vadd.f32 %v1559_v11, %v1547_v10 }
 0x7c8   : > { %v1573_v13 = vadd.f32 %v1572_v3, %v1560_v12 }
 0x7ca   : > { %v1576_v14 = vadd.f32 %v1573_v13, %v2960_v27 }
 0x7cb   : > { %v1548_v15 = vpop.f32.mrf.mxu2 }
 0x7cc   : > { %v1561_v16 = vpop.f32.mrf.mxu3  ;;  %1577 = vadd.xlane.f32.xlu1 %v1576_v14 }
 0x83f   : > { %v1578_v4 = vpop.xlane.xlu1 %1577 }
 0x840   : > { %v1579_v17 = vmul.f32 %v1578_v4, %v2949_v25 }
 0x842   : > { %v1580_v18 = vsub.f32 %v1576_v14, %v1579_v17 }
 0x844   : > { %v1581_v19 = vmul.f32 %v1580_v18, %v1580_v18 }
 0x846   : > { %1582 = vadd.xlane.f32.xlu2 %v1581_v19 }
 0x8b9   : > { %v1583_v20 = vpop.xlane.xlu2 %1582 }
 0x8ba   : > { %v1584_v21 = vmul.f32 %v1583_v20, %v2949_v25 }
 0x8bc   : > { %v1585_v62 = vadd.f32 1e-05, %v1584_v21 }
 0x8be   : > { %2399 = vrsqrt.f32 %v1585_v62  ;;  %vm1592_vm9 = vweird.f32 %v1585_v62 }
 0x8c4   : > { %v2400_v22 = vpop.eup %2399 }
 0x8c5   : > { %v1587_v23 = vmul.f32 %v2400_v22, %v1585_v62  ;;  %vm1593_vm8 = vweird.f32 %v2400_v22 }
 0x8c6   : > { %vm1594_vm10 = vmor %vm1592_vm9, %vm1593_vm8 }
 0x8c7   : > { %v1588_v24 = vmul.f32 %v2400_v22, %v1587_v23 }
 0x8c9   : > { %v1589_v26 = vmul.f32 0.5, %v1588_v24 }
 0x8cb   : > { %v1590_v27 = vsub.f32 1.5, %v1589_v26 }
 0x8cd   : > { %v1591_v29 = vmul.f32 %v2400_v22, %v1590_v27 }
 0x8cf   : > { %v1595_v25 = vsel %vm1594_vm10, %v2400_v22, %v1591_v29 }
 0x8d0   : > { %v1596_v31 = vmul.f32 %v1595_v25, %v1580_v18 }
 0x8d2   : > { %v1598_v33 = vmul.f32 %v1597_v30, %v1596_v31 }
 0x8d4   : > { %v1600_v28 = vadd.f32 %v1599_v32, %v1598_v33 }
 0x8d6   : > { %1601 = vst [vmem:[%s390_s21] sm:$0xff] %v1600_v28 }
 0x8d7   : > { %2638 = shalt.err (!%p2635_p9)
}
 0x8d8   : > { %2287 = dma.vmem_to_hbm [thread:$0]  (%p2845_p4), %s1616_s22, 128, %s1618_s23, %s1603_s8  }
 0x8d9 PF: > { %s1629_s18 = sand.u32 1, %s2677_s24   ;;  %p3024_p10 = scmp.ge.s32.totalorder %s2689_s27, 2 }
 0x8da   : > { %s1630_s15 = scalar_lea.sflag [#allocation4], %s1629_s18 }
 0x8db   : > { %p2313_p13 = pnand %p3024_p10, %p2849_p6 }
 0x8dd   : > { %p2314_p11 = pneg %p2313_p13 }
 0x8df   : > { %2672 = dma.done.wait (%p2314_p11), %s1630_s15, 128  }
 0x8e0   : > { %2674 = vsyncadd (%p2314_p11), %s1630_s15, 4294967168  ;;  %p23_p0 = scmp.ge.s32.totalorder %s2819_s16, 4   ;;  %s3025_s24 = smov %s2681_s25 }
 0x8e1   : > { %s3026_s25 = smov %s2685_s26  ;;  %s3027_s26 = smov %s2830_s14 }
 0x8e2   : > { %s3028_s27 = smov %s2819_s16  ;;  %25 = sbr.rel (!%p23_p0) target bundleno = 11 (0xb), region = 120 }
 0x8e7   :  { %1636 = vsyncpa [#allocation3], 1 }
 0x8e8   :  { %1638 = vsyncpa [#allocation3 + $0x1], 1 }
 0x8e9   :  { %1639 = vsyncpa [#allocation6], 1 }
 0x8ea   :  { %1640 = vsyncpa [#allocation9], 1 }
 0x8eb   :  { %1641 = vsyncpa [#allocation12], 1 }
 0x8ec   :  { %1642 = vsyncpa [#allocation4], 1 }
 0x8ed   :  { %1644 = vsyncpa [#allocation4 + $0x1], 1 }

</bundles_post_ra>
